<compile_context>
chip_gen: v5e
topology: v5e:2x2
jax: 0.10.0
libtpu: 0.0.40
codegen_flags: <defaults>
</compile_context>

<pallas_src>
import functools

import jax
import jax.numpy as jnp
from jax.experimental import pallas as pl
from jax.experimental.pallas import tpu as pltpu

LANES = 128


def _round_up(n, m):
    return ((n + m - 1) // m) * m


def _tree_sum(terms):
    """Pairwise (tree) sum to shorten the serial dependency chain."""
    terms = list(terms)
    while len(terms) > 1:
        nxt = [terms[i] + terms[i + 1] for i in range(0, len(terms) - 1, 2)]
        if len(terms) % 2:
            nxt.append(terms[-1])
        terms = nxt
    return terms[0]


def pack_params_flat(params):
    """Flatten [(W(in,out), b(out,)), ...] into one 1-D f32 table for SMEM.

    Per layer: W in row-major order (flat index k*out_dim + j), then b (index j).
    Returns (flat_params, sizes) with sizes[i] = (in_dim, out_dim) as Python ints.
    """
    parts = []
    sizes = []
    for w, b in params:
        in_dim, out_dim = w.shape
        sizes.append((int(in_dim), int(out_dim)))
        parts.append(jnp.reshape(w.astype(jnp.float32), (-1,)))
        parts.append(jnp.reshape(b.astype(jnp.float32), (-1,)))
    return jnp.concatenate(parts), tuple(sizes)


def _mlp_kernel(x_ref, p_ref, o_ref, *, sizes):
    """Whole 5-layer forward for one batch tile (batch on lanes, features on sublanes).

    x_ref: (1, TB)  f32 VMEM  -- input feature row for TB batch columns.
    p_ref: (P,)     f32 SMEM  -- flat packed weights/biases, read as scalars.
    o_ref: (8, TB)  f32 VMEM  -- rows 0..out_dim-1 hold the result, rest zeroed.
    """
    n_layers = len(sizes)
    h_rows = [x_ref[...]]                       # list of (1, TB) feature rows
    off = 0
    for li, (in_dim, out_dim) in enumerate(sizes):
        new_rows = []
        for j in range(out_dim):
            # Scalar-weight * lane-dense-vector FMAs, tree-accumulated (no MXU).
            terms = [p_ref[off + k * out_dim + j] * h_rows[k] for k in range(in_dim)]
            acc = _tree_sum(terms) + p_ref[off + in_dim * out_dim + j]   # + bias
            if li < n_layers - 1:
                acc = 1.0 / (1.0 + jnp.exp(-acc))   # exact sigmoid (EUP exp + divide)
            new_rows.append(acc)
        h_rows = new_rows
        off += in_dim * out_dim + out_dim

    pad_rows = o_ref.shape[0] - len(h_rows)
    zero = jnp.zeros_like(h_rows[0])
    o_ref[...] = jnp.concatenate(h_rows + [zero] * pad_rows, axis=0)


def mlp_forward(x, params):
    """x: (batch, 1) f32. params: list of (W(in,out), b(out,)). Returns (batch, 2)."""
    batch, in_dim = x.shape
    flat_params, sizes = pack_params_flat(params)
    assert in_dim == sizes[0][0]
    out_dim = sizes[-1][1]

    # Batch lives on the lane axis.  Big lane-dense tiles amortize per-step overhead;
    # keep the grid >= 2 steps when batch allows (v7x two-TensorCore sharding).
    b_128 = _round_up(max(batch, 1), LANES)
    if b_128 <= LANES:
        tb = LANES
    else:
        tb = min(2048, _round_up((b_128 + 1) // 2, LANES))
    b_pad = _round_up(b_128, tb)
    grid = b_pad // tb

    # (batch, 1) -> (1, b_pad): essentially a free transpose + small lane pad.
    x_t = jnp.zeros((1, b_pad), jnp.float32).at[:, :batch].set(
        x.astype(jnp.float32).T)

    kernel = functools.partial(_mlp_kernel, sizes=sizes)
    out = pl.pallas_call(
        kernel,
        out_shape=jax.ShapeDtypeStruct((8, b_pad), jnp.float32),
        grid=(grid,),
        in_specs=[
            pl.BlockSpec((1, tb), lambda i: (0, i)),               # activations (pipelined)
            pl.BlockSpec(memory_space=pltpu.MemorySpace.SMEM),     # 112 scalar params
        ],
        out_specs=pl.BlockSpec((8, tb), lambda i: (0, i)),
        compiler_params=pltpu.CompilerParams(
            dimension_semantics=("parallel",)),
    )(x_t, flat_params)

    # Trim padded rows/columns and go back to (batch, out_dim).
    return out[:out_dim, :batch].T


def init_params(key):
    """Mimics PyTorch nn.Linear default init: U[-1/sqrt(fan_in), 1/sqrt(fan_in)]."""
    sizes = [(1, 5), (5, 5), (5, 5), (5, 5), (5, 2)]
    params = []
    for fan_in, fan_out in sizes:
        key, kw, kb = jax.random.split(key, 3)
        bound = 1.0 / jnp.sqrt(float(fan_in))
        w = jax.random.uniform(kw, (fan_in, fan_out), jnp.float32, -bound, bound)
        b = jax.random.uniform(kb, (fan_out,), jnp.float32, -bound, bound)
        params.append((w, b))
    return params


def reference_forward(x, params):
    h = x
    n = len(params)
    for i, (w, b) in enumerate(params):
        h = h @ w + b
        if i < n - 1:
            h = jax.nn.sigmoid(h)
    return h


if __name__ == "__main__":
    key = jax.random.PRNGKey(0)
    key, kx = jax.random.split(key)
    batch = 8
    x = jax.random.normal(kx, (batch, 1), dtype=jnp.float32)

    params = init_params(key)

    out = mlp_forward(x, params)
    out = jax.block_until_ready(out)

    ref = reference_forward(x, params)
    assert out.shape == (batch, 2), out.shape
    max_err = jnp.max(jnp.abs(out - ref))
    assert jnp.allclose(out, ref, atol=1e-5, rtol=1e-5), f"mismatch, max abs err={max_err}"

    print("KERNEL_OK")
</pallas_src>

<mosaic_0001>
module attributes {stable_mosaic.version = 11 : i64} {
  func.func @_mlp_kernel(%arg0: i32, %arg1: memref<1x128xf32, #tpu.memory_space<vmem>>, %arg2: memref<112xf32, #tpu.memory_space<smem>>, %arg3: memref<8x128xf32, #tpu.memory_space<vmem>>) attributes {dimension_semantics = [#tpu.dimension_semantics<parallel>], iteration_bounds = array<i64: 1>, scalar_prefetch = 0 : i64, scratch_operands = 0 : i64, tpu.core_type = #tpu.core_type<tc>, window_params = [{transform_indices = @transform_0, window_bounds = array<i64: 1, 128>}, {transform_indices = @transform_1, window_bounds = array<i64: 112>}, {transform_indices = @transform_2, window_bounds = array<i64: 8, 128>}]} {
    %c0 = arith.constant 0 : index
    %c0_0 = arith.constant 0 : index
    %0 = vector.load %arg1[%c0, %c0_0] : memref<1x128xf32, #tpu.memory_space<vmem>>, vector<1x128xf32>
    %c0_1 = arith.constant 0 : index
    %1 = memref.load %arg2[%c0_1] : memref<112xf32, #tpu.memory_space<smem>>
    %2 = vector.broadcast %1 : f32 to vector<1x128xf32>
    %3 = arith.mulf %2, %0 : vector<1x128xf32>
    %c5 = arith.constant 5 : index
    %4 = memref.load %arg2[%c5] : memref<112xf32, #tpu.memory_space<smem>>
    %5 = vector.broadcast %4 : f32 to vector<1x128xf32>
    %6 = arith.addf %3, %5 : vector<1x128xf32>
    %cst = arith.constant 0.000000e+00 : f32
    %7 = vector.broadcast %cst : f32 to vector<1x128xf32>
    %8 = arith.subf %7, %6 : vector<1x128xf32>
    %9 = math.exp %8 : vector<1x128xf32>
    %cst_2 = arith.constant 1.000000e+00 : f32
    %10 = vector.broadcast %cst_2 : f32 to vector<1x128xf32>
    %11 = arith.addf %10, %9 : vector<1x128xf32>
    %cst_3 = arith.constant 1.000000e+00 : f32
    %12 = vector.broadcast %cst_3 : f32 to vector<1x128xf32>
    %13 = arith.divf %12, %11 : vector<1x128xf32>
    %c1 = arith.constant 1 : index
    %14 = memref.load %arg2[%c1] : memref<112xf32, #tpu.memory_space<smem>>
    %15 = vector.broadcast %14 : f32 to vector<1x128xf32>
    %16 = arith.mulf %15, %0 : vector<1x128xf32>
    %c6 = arith.constant 6 : index
    %17 = memref.load %arg2[%c6] : memref<112xf32, #tpu.memory_space<smem>>
    %18 = vector.broadcast %17 : f32 to vector<1x128xf32>
    %19 = arith.addf %16, %18 : vector<1x128xf32>
    %cst_4 = arith.constant 0.000000e+00 : f32
    %20 = vector.broadcast %cst_4 : f32 to vector<1x128xf32>
    %21 = arith.subf %20, %19 : vector<1x128xf32>
    %22 = math.exp %21 : vector<1x128xf32>
    %cst_5 = arith.constant 1.000000e+00 : f32
    %23 = vector.broadcast %cst_5 : f32 to vector<1x128xf32>
    %24 = arith.addf %23, %22 : vector<1x128xf32>
    %cst_6 = arith.constant 1.000000e+00 : f32
    %25 = vector.broadcast %cst_6 : f32 to vector<1x128xf32>
    %26 = arith.divf %25, %24 : vector<1x128xf32>
    %c2 = arith.constant 2 : index
    %27 = memref.load %arg2[%c2] : memref<112xf32, #tpu.memory_space<smem>>
    %28 = vector.broadcast %27 : f32 to vector<1x128xf32>
    %29 = arith.mulf %28, %0 : vector<1x128xf32>
    %c7 = arith.constant 7 : index
    %30 = memref.load %arg2[%c7] : memref<112xf32, #tpu.memory_space<smem>>
    %31 = vector.broadcast %30 : f32 to vector<1x128xf32>
    %32 = arith.addf %29, %31 : vector<1x128xf32>
    %cst_7 = arith.constant 0.000000e+00 : f32
    %33 = vector.broadcast %cst_7 : f32 to vector<1x128xf32>
    %34 = arith.subf %33, %32 : vector<1x128xf32>
    %35 = math.exp %34 : vector<1x128xf32>
    %cst_8 = arith.constant 1.000000e+00 : f32
    %36 = vector.broadcast %cst_8 : f32 to vector<1x128xf32>
    %37 = arith.addf %36, %35 : vector<1x128xf32>
    %cst_9 = arith.constant 1.000000e+00 : f32
    %38 = vector.broadcast %cst_9 : f32 to vector<1x128xf32>
    %39 = arith.divf %38, %37 : vector<1x128xf32>
    %c3 = arith.constant 3 : index
    %40 = memref.load %arg2[%c3] : memref<112xf32, #tpu.memory_space<smem>>
    %41 = vector.broadcast %40 : f32 to vector<1x128xf32>
    %42 = arith.mulf %41, %0 : vector<1x128xf32>
    %c8 = arith.constant 8 : index
    %43 = memref.load %arg2[%c8] : memref<112xf32, #tpu.memory_space<smem>>
    %44 = vector.broadcast %43 : f32 to vector<1x128xf32>
    %45 = arith.addf %42, %44 : vector<1x128xf32>
    %cst_10 = arith.constant 0.000000e+00 : f32
    %46 = vector.broadcast %cst_10 : f32 to vector<1x128xf32>
    %47 = arith.subf %46, %45 : vector<1x128xf32>
    %48 = math.exp %47 : vector<1x128xf32>
    %cst_11 = arith.constant 1.000000e+00 : f32
    %49 = vector.broadcast %cst_11 : f32 to vector<1x128xf32>
    %50 = arith.addf %49, %48 : vector<1x128xf32>
    %cst_12 = arith.constant 1.000000e+00 : f32
    %51 = vector.broadcast %cst_12 : f32 to vector<1x128xf32>
    %52 = arith.divf %51, %50 : vector<1x128xf32>
    %c4 = arith.constant 4 : index
    %53 = memref.load %arg2[%c4] : memref<112xf32, #tpu.memory_space<smem>>
    %54 = vector.broadcast %53 : f32 to vector<1x128xf32>
    %55 = arith.mulf %54, %0 : vector<1x128xf32>
    %c9 = arith.constant 9 : index
    %56 = memref.load %arg2[%c9] : memref<112xf32, #tpu.memory_space<smem>>
    %57 = vector.broadcast %56 : f32 to vector<1x128xf32>
    %58 = arith.addf %55, %57 : vector<1x128xf32>
    %cst_13 = arith.constant 0.000000e+00 : f32
    %59 = vector.broadcast %cst_13 : f32 to vector<1x128xf32>
    %60 = arith.subf %59, %58 : vector<1x128xf32>
    %61 = math.exp %60 : vector<1x128xf32>
    %cst_14 = arith.constant 1.000000e+00 : f32
    %62 = vector.broadcast %cst_14 : f32 to vector<1x128xf32>
    %63 = arith.addf %62, %61 : vector<1x128xf32>
    %cst_15 = arith.constant 1.000000e+00 : f32
    %64 = vector.broadcast %cst_15 : f32 to vector<1x128xf32>
    %65 = arith.divf %64, %63 : vector<1x128xf32>
    %c10 = arith.constant 10 : index
    %66 = memref.load %arg2[%c10] : memref<112xf32, #tpu.memory_space<smem>>
    %67 = vector.broadcast %66 : f32 to vector<1x128xf32>
    %68 = arith.mulf %67, %13 : vector<1x128xf32>
    %c15 = arith.constant 15 : index
    %69 = memref.load %arg2[%c15] : memref<112xf32, #tpu.memory_space<smem>>
    %70 = vector.broadcast %69 : f32 to vector<1x128xf32>
    %71 = arith.mulf %70, %26 : vector<1x128xf32>
    %c20 = arith.constant 20 : index
    %72 = memref.load %arg2[%c20] : memref<112xf32, #tpu.memory_space<smem>>
    %73 = vector.broadcast %72 : f32 to vector<1x128xf32>
    %74 = arith.mulf %73, %39 : vector<1x128xf32>
    %c25 = arith.constant 25 : index
    %75 = memref.load %arg2[%c25] : memref<112xf32, #tpu.memory_space<smem>>
    %76 = vector.broadcast %75 : f32 to vector<1x128xf32>
    %77 = arith.mulf %76, %52 : vector<1x128xf32>
    %c30 = arith.constant 30 : index
    %78 = memref.load %arg2[%c30] : memref<112xf32, #tpu.memory_space<smem>>
    %79 = vector.broadcast %78 : f32 to vector<1x128xf32>
    %80 = arith.mulf %79, %65 : vector<1x128xf32>
    %81 = arith.addf %68, %71 : vector<1x128xf32>
    %82 = arith.addf %74, %77 : vector<1x128xf32>
    %83 = arith.addf %81, %82 : vector<1x128xf32>
    %84 = arith.addf %83, %80 : vector<1x128xf32>
    %c35 = arith.constant 35 : index
    %85 = memref.load %arg2[%c35] : memref<112xf32, #tpu.memory_space<smem>>
    %86 = vector.broadcast %85 : f32 to vector<1x128xf32>
    %87 = arith.addf %84, %86 : vector<1x128xf32>
    %cst_16 = arith.constant 0.000000e+00 : f32
    %88 = vector.broadcast %cst_16 : f32 to vector<1x128xf32>
    %89 = arith.subf %88, %87 : vector<1x128xf32>
    %90 = math.exp %89 : vector<1x128xf32>
    %cst_17 = arith.constant 1.000000e+00 : f32
    %91 = vector.broadcast %cst_17 : f32 to vector<1x128xf32>
    %92 = arith.addf %91, %90 : vector<1x128xf32>
    %cst_18 = arith.constant 1.000000e+00 : f32
    %93 = vector.broadcast %cst_18 : f32 to vector<1x128xf32>
    %94 = arith.divf %93, %92 : vector<1x128xf32>
    %c11 = arith.constant 11 : index
    %95 = memref.load %arg2[%c11] : memref<112xf32, #tpu.memory_space<smem>>
    %96 = vector.broadcast %95 : f32 to vector<1x128xf32>
    %97 = arith.mulf %96, %13 : vector<1x128xf32>
    %c16 = arith.constant 16 : index
    %98 = memref.load %arg2[%c16] : memref<112xf32, #tpu.memory_space<smem>>
    %99 = vector.broadcast %98 : f32 to vector<1x128xf32>
    %100 = arith.mulf %99, %26 : vector<1x128xf32>
    %c21 = arith.constant 21 : index
    %101 = memref.load %arg2[%c21] : memref<112xf32, #tpu.memory_space<smem>>
    %102 = vector.broadcast %101 : f32 to vector<1x128xf32>
    %103 = arith.mulf %102, %39 : vector<1x128xf32>
    %c26 = arith.constant 26 : index
    %104 = memref.load %arg2[%c26] : memref<112xf32, #tpu.memory_space<smem>>
    %105 = vector.broadcast %104 : f32 to vector<1x128xf32>
    %106 = arith.mulf %105, %52 : vector<1x128xf32>
    %c31 = arith.constant 31 : index
    %107 = memref.load %arg2[%c31] : memref<112xf32, #tpu.memory_space<smem>>
    %108 = vector.broadcast %107 : f32 to vector<1x128xf32>
    %109 = arith.mulf %108, %65 : vector<1x128xf32>
    %110 = arith.addf %97, %100 : vector<1x128xf32>
    %111 = arith.addf %103, %106 : vector<1x128xf32>
    %112 = arith.addf %110, %111 : vector<1x128xf32>
    %113 = arith.addf %112, %109 : vector<1x128xf32>
    %c36 = arith.constant 36 : index
    %114 = memref.load %arg2[%c36] : memref<112xf32, #tpu.memory_space<smem>>
    %115 = vector.broadcast %114 : f32 to vector<1x128xf32>
    %116 = arith.addf %113, %115 : vector<1x128xf32>
    %cst_19 = arith.constant 0.000000e+00 : f32
    %117 = vector.broadcast %cst_19 : f32 to vector<1x128xf32>
    %118 = arith.subf %117, %116 : vector<1x128xf32>
    %119 = math.exp %118 : vector<1x128xf32>
    %cst_20 = arith.constant 1.000000e+00 : f32
    %120 = vector.broadcast %cst_20 : f32 to vector<1x128xf32>
    %121 = arith.addf %120, %119 : vector<1x128xf32>
    %cst_21 = arith.constant 1.000000e+00 : f32
    %122 = vector.broadcast %cst_21 : f32 to vector<1x128xf32>
    %123 = arith.divf %122, %121 : vector<1x128xf32>
    %c12 = arith.constant 12 : index
    %124 = memref.load %arg2[%c12] : memref<112xf32, #tpu.memory_space<smem>>
    %125 = vector.broadcast %124 : f32 to vector<1x128xf32>
    %126 = arith.mulf %125, %13 : vector<1x128xf32>
    %c17 = arith.constant 17 : index
    %127 = memref.load %arg2[%c17] : memref<112xf32, #tpu.memory_space<smem>>
    %128 = vector.broadcast %127 : f32 to vector<1x128xf32>
    %129 = arith.mulf %128, %26 : vector<1x128xf32>
    %c22 = arith.constant 22 : index
    %130 = memref.load %arg2[%c22] : memref<112xf32, #tpu.memory_space<smem>>
    %131 = vector.broadcast %130 : f32 to vector<1x128xf32>
    %132 = arith.mulf %131, %39 : vector<1x128xf32>
    %c27 = arith.constant 27 : index
    %133 = memref.load %arg2[%c27] : memref<112xf32, #tpu.memory_space<smem>>
    %134 = vector.broadcast %133 : f32 to vector<1x128xf32>
    %135 = arith.mulf %134, %52 : vector<1x128xf32>
    %c32 = arith.constant 32 : index
    %136 = memref.load %arg2[%c32] : memref<112xf32, #tpu.memory_space<smem>>
    %137 = vector.broadcast %136 : f32 to vector<1x128xf32>
    %138 = arith.mulf %137, %65 : vector<1x128xf32>
    %139 = arith.addf %126, %129 : vector<1x128xf32>
    %140 = arith.addf %132, %135 : vector<1x128xf32>
    %141 = arith.addf %139, %140 : vector<1x128xf32>
    %142 = arith.addf %141, %138 : vector<1x128xf32>
    %c37 = arith.constant 37 : index
    %143 = memref.load %arg2[%c37] : memref<112xf32, #tpu.memory_space<smem>>
    %144 = vector.broadcast %143 : f32 to vector<1x128xf32>
    %145 = arith.addf %142, %144 : vector<1x128xf32>
    %cst_22 = arith.constant 0.000000e+00 : f32
    %146 = vector.broadcast %cst_22 : f32 to vector<1x128xf32>
    %147 = arith.subf %146, %145 : vector<1x128xf32>
    %148 = math.exp %147 : vector<1x128xf32>
    %cst_23 = arith.constant 1.000000e+00 : f32
    %149 = vector.broadcast %cst_23 : f32 to vector<1x128xf32>
    %150 = arith.addf %149, %148 : vector<1x128xf32>
    %cst_24 = arith.constant 1.000000e+00 : f32
    %151 = vector.broadcast %cst_24 : f32 to vector<1x128xf32>
    %152 = arith.divf %151, %150 : vector<1x128xf32>
    %c13 = arith.constant 13 : index
    %153 = memref.load %arg2[%c13] : memref<112xf32, #tpu.memory_space<smem>>
    %154 = vector.broadcast %153 : f32 to vector<1x128xf32>
    %155 = arith.mulf %154, %13 : vector<1x128xf32>
    %c18 = arith.constant 18 : index
    %156 = memref.load %arg2[%c18] : memref<112xf32, #tpu.memory_space<smem>>
    %157 = vector.broadcast %156 : f32 to vector<1x128xf32>
    %158 = arith.mulf %157, %26 : vector<1x128xf32>
    %c23 = arith.constant 23 : index
    %159 = memref.load %arg2[%c23] : memref<112xf32, #tpu.memory_space<smem>>
    %160 = vector.broadcast %159 : f32 to vector<1x128xf32>
    %161 = arith.mulf %160, %39 : vector<1x128xf32>
    %c28 = arith.constant 28 : index
    %162 = memref.load %arg2[%c28] : memref<112xf32, #tpu.memory_space<smem>>
    %163 = vector.broadcast %162 : f32 to vector<1x128xf32>
    %164 = arith.mulf %163, %52 : vector<1x128xf32>
    %c33 = arith.constant 33 : index
    %165 = memref.load %arg2[%c33] : memref<112xf32, #tpu.memory_space<smem>>
    %166 = vector.broadcast %165 : f32 to vector<1x128xf32>
    %167 = arith.mulf %166, %65 : vector<1x128xf32>
    %168 = arith.addf %155, %158 : vector<1x128xf32>
    %169 = arith.addf %161, %164 : vector<1x128xf32>
    %170 = arith.addf %168, %169 : vector<1x128xf32>
    %171 = arith.addf %170, %167 : vector<1x128xf32>
    %c38 = arith.constant 38 : index
    %172 = memref.load %arg2[%c38] : memref<112xf32, #tpu.memory_space<smem>>
    %173 = vector.broadcast %172 : f32 to vector<1x128xf32>
    %174 = arith.addf %171, %173 : vector<1x128xf32>
    %cst_25 = arith.constant 0.000000e+00 : f32
    %175 = vector.broadcast %cst_25 : f32 to vector<1x128xf32>
    %176 = arith.subf %175, %174 : vector<1x128xf32>
    %177 = math.exp %176 : vector<1x128xf32>
    %cst_26 = arith.constant 1.000000e+00 : f32
    %178 = vector.broadcast %cst_26 : f32 to vector<1x128xf32>
    %179 = arith.addf %178, %177 : vector<1x128xf32>
    %cst_27 = arith.constant 1.000000e+00 : f32
    %180 = vector.broadcast %cst_27 : f32 to vector<1x128xf32>
    %181 = arith.divf %180, %179 : vector<1x128xf32>
    %c14 = arith.constant 14 : index
    %182 = memref.load %arg2[%c14] : memref<112xf32, #tpu.memory_space<smem>>
    %183 = vector.broadcast %182 : f32 to vector<1x128xf32>
    %184 = arith.mulf %183, %13 : vector<1x128xf32>
    %c19 = arith.constant 19 : index
    %185 = memref.load %arg2[%c19] : memref<112xf32, #tpu.memory_space<smem>>
    %186 = vector.broadcast %185 : f32 to vector<1x128xf32>
    %187 = arith.mulf %186, %26 : vector<1x128xf32>
    %c24 = arith.constant 24 : index
    %188 = memref.load %arg2[%c24] : memref<112xf32, #tpu.memory_space<smem>>
    %189 = vector.broadcast %188 : f32 to vector<1x128xf32>
    %190 = arith.mulf %189, %39 : vector<1x128xf32>
    %c29 = arith.constant 29 : index
    %191 = memref.load %arg2[%c29] : memref<112xf32, #tpu.memory_space<smem>>
    %192 = vector.broadcast %191 : f32 to vector<1x128xf32>
    %193 = arith.mulf %192, %52 : vector<1x128xf32>
    %c34 = arith.constant 34 : index
    %194 = memref.load %arg2[%c34] : memref<112xf32, #tpu.memory_space<smem>>
    %195 = vector.broadcast %194 : f32 to vector<1x128xf32>
    %196 = arith.mulf %195, %65 : vector<1x128xf32>
    %197 = arith.addf %184, %187 : vector<1x128xf32>
    %198 = arith.addf %190, %193 : vector<1x128xf32>
    %199 = arith.addf %197, %198 : vector<1x128xf32>
    %200 = arith.addf %199, %196 : vector<1x128xf32>
    %c39 = arith.constant 39 : index
    %201 = memref.load %arg2[%c39] : memref<112xf32, #tpu.memory_space<smem>>
    %202 = vector.broadcast %201 : f32 to vector<1x128xf32>
    %203 = arith.addf %200, %202 : vector<1x128xf32>
    %cst_28 = arith.constant 0.000000e+00 : f32
    %204 = vector.broadcast %cst_28 : f32 to vector<1x128xf32>
    %205 = arith.subf %204, %203 : vector<1x128xf32>
    %206 = math.exp %205 : vector<1x128xf32>
    %cst_29 = arith.constant 1.000000e+00 : f32
    %207 = vector.broadcast %cst_29 : f32 to vector<1x128xf32>
    %208 = arith.addf %207, %206 : vector<1x128xf32>
    %cst_30 = arith.constant 1.000000e+00 : f32
    %209 = vector.broadcast %cst_30 : f32 to vector<1x128xf32>
    %210 = arith.divf %209, %208 : vector<1x128xf32>
    %c40 = arith.constant 40 : index
    %211 = memref.load %arg2[%c40] : memref<112xf32, #tpu.memory_space<smem>>
    %212 = vector.broadcast %211 : f32 to vector<1x128xf32>
    %213 = arith.mulf %212, %94 : vector<1x128xf32>
    %c45 = arith.constant 45 : index
    %214 = memref.load %arg2[%c45] : memref<112xf32, #tpu.memory_space<smem>>
    %215 = vector.broadcast %214 : f32 to vector<1x128xf32>
    %216 = arith.mulf %215, %123 : vector<1x128xf32>
    %c50 = arith.constant 50 : index
    %217 = memref.load %arg2[%c50] : memref<112xf32, #tpu.memory_space<smem>>
    %218 = vector.broadcast %217 : f32 to vector<1x128xf32>
    %219 = arith.mulf %218, %152 : vector<1x128xf32>
    %c55 = arith.constant 55 : index
    %220 = memref.load %arg2[%c55] : memref<112xf32, #tpu.memory_space<smem>>
    %221 = vector.broadcast %220 : f32 to vector<1x128xf32>
    %222 = arith.mulf %221, %181 : vector<1x128xf32>
    %c60 = arith.constant 60 : index
    %223 = memref.load %arg2[%c60] : memref<112xf32, #tpu.memory_space<smem>>
    %224 = vector.broadcast %223 : f32 to vector<1x128xf32>
    %225 = arith.mulf %224, %210 : vector<1x128xf32>
    %226 = arith.addf %213, %216 : vector<1x128xf32>
    %227 = arith.addf %219, %222 : vector<1x128xf32>
    %228 = arith.addf %226, %227 : vector<1x128xf32>
    %229 = arith.addf %228, %225 : vector<1x128xf32>
    %c65 = arith.constant 65 : index
    %230 = memref.load %arg2[%c65] : memref<112xf32, #tpu.memory_space<smem>>
    %231 = vector.broadcast %230 : f32 to vector<1x128xf32>
    %232 = arith.addf %229, %231 : vector<1x128xf32>
    %cst_31 = arith.constant 0.000000e+00 : f32
    %233 = vector.broadcast %cst_31 : f32 to vector<1x128xf32>
    %234 = arith.subf %233, %232 : vector<1x128xf32>
    %235 = math.exp %234 : vector<1x128xf32>
    %cst_32 = arith.constant 1.000000e+00 : f32
    %236 = vector.broadcast %cst_32 : f32 to vector<1x128xf32>
    %237 = arith.addf %236, %235 : vector<1x128xf32>
    %cst_33 = arith.constant 1.000000e+00 : f32
    %238 = vector.broadcast %cst_33 : f32 to vector<1x128xf32>
    %239 = arith.divf %238, %237 : vector<1x128xf32>
    %c41 = arith.constant 41 : index
    %240 = memref.load %arg2[%c41] : memref<112xf32, #tpu.memory_space<smem>>
    %241 = vector.broadcast %240 : f32 to vector<1x128xf32>
    %242 = arith.mulf %241, %94 : vector<1x128xf32>
    %c46 = arith.constant 46 : index
    %243 = memref.load %arg2[%c46] : memref<112xf32, #tpu.memory_space<smem>>
    %244 = vector.broadcast %243 : f32 to vector<1x128xf32>
    %245 = arith.mulf %244, %123 : vector<1x128xf32>
    %c51 = arith.constant 51 : index
    %246 = memref.load %arg2[%c51] : memref<112xf32, #tpu.memory_space<smem>>
    %247 = vector.broadcast %246 : f32 to vector<1x128xf32>
    %248 = arith.mulf %247, %152 : vector<1x128xf32>
    %c56 = arith.constant 56 : index
    %249 = memref.load %arg2[%c56] : memref<112xf32, #tpu.memory_space<smem>>
    %250 = vector.broadcast %249 : f32 to vector<1x128xf32>
    %251 = arith.mulf %250, %181 : vector<1x128xf32>
    %c61 = arith.constant 61 : index
    %252 = memref.load %arg2[%c61] : memref<112xf32, #tpu.memory_space<smem>>
    %253 = vector.broadcast %252 : f32 to vector<1x128xf32>
    %254 = arith.mulf %253, %210 : vector<1x128xf32>
    %255 = arith.addf %242, %245 : vector<1x128xf32>
    %256 = arith.addf %248, %251 : vector<1x128xf32>
    %257 = arith.addf %255, %256 : vector<1x128xf32>
    %258 = arith.addf %257, %254 : vector<1x128xf32>
    %c66 = arith.constant 66 : index
    %259 = memref.load %arg2[%c66] : memref<112xf32, #tpu.memory_space<smem>>
    %260 = vector.broadcast %259 : f32 to vector<1x128xf32>
    %261 = arith.addf %258, %260 : vector<1x128xf32>
    %cst_34 = arith.constant 0.000000e+00 : f32
    %262 = vector.broadcast %cst_34 : f32 to vector<1x128xf32>
    %263 = arith.subf %262, %261 : vector<1x128xf32>
    %264 = math.exp %263 : vector<1x128xf32>
    %cst_35 = arith.constant 1.000000e+00 : f32
    %265 = vector.broadcast %cst_35 : f32 to vector<1x128xf32>
    %266 = arith.addf %265, %264 : vector<1x128xf32>
    %cst_36 = arith.constant 1.000000e+00 : f32
    %267 = vector.broadcast %cst_36 : f32 to vector<1x128xf32>
    %268 = arith.divf %267, %266 : vector<1x128xf32>
    %c42 = arith.constant 42 : index
    %269 = memref.load %arg2[%c42] : memref<112xf32, #tpu.memory_space<smem>>
    %270 = vector.broadcast %269 : f32 to vector<1x128xf32>
    %271 = arith.mulf %270, %94 : vector<1x128xf32>
    %c47 = arith.constant 47 : index
    %272 = memref.load %arg2[%c47] : memref<112xf32, #tpu.memory_space<smem>>
    %273 = vector.broadcast %272 : f32 to vector<1x128xf32>
    %274 = arith.mulf %273, %123 : vector<1x128xf32>
    %c52 = arith.constant 52 : index
    %275 = memref.load %arg2[%c52] : memref<112xf32, #tpu.memory_space<smem>>
    %276 = vector.broadcast %275 : f32 to vector<1x128xf32>
    %277 = arith.mulf %276, %152 : vector<1x128xf32>
    %c57 = arith.constant 57 : index
    %278 = memref.load %arg2[%c57] : memref<112xf32, #tpu.memory_space<smem>>
    %279 = vector.broadcast %278 : f32 to vector<1x128xf32>
    %280 = arith.mulf %279, %181 : vector<1x128xf32>
    %c62 = arith.constant 62 : index
    %281 = memref.load %arg2[%c62] : memref<112xf32, #tpu.memory_space<smem>>
    %282 = vector.broadcast %281 : f32 to vector<1x128xf32>
    %283 = arith.mulf %282, %210 : vector<1x128xf32>
    %284 = arith.addf %271, %274 : vector<1x128xf32>
    %285 = arith.addf %277, %280 : vector<1x128xf32>
    %286 = arith.addf %284, %285 : vector<1x128xf32>
    %287 = arith.addf %286, %283 : vector<1x128xf32>
    %c67 = arith.constant 67 : index
    %288 = memref.load %arg2[%c67] : memref<112xf32, #tpu.memory_space<smem>>
    %289 = vector.broadcast %288 : f32 to vector<1x128xf32>
    %290 = arith.addf %287, %289 : vector<1x128xf32>
    %cst_37 = arith.constant 0.000000e+00 : f32
    %291 = vector.broadcast %cst_37 : f32 to vector<1x128xf32>
    %292 = arith.subf %291, %290 : vector<1x128xf32>
    %293 = math.exp %292 : vector<1x128xf32>
    %cst_38 = arith.constant 1.000000e+00 : f32
    %294 = vector.broadcast %cst_38 : f32 to vector<1x128xf32>
    %295 = arith.addf %294, %293 : vector<1x128xf32>
    %cst_39 = arith.constant 1.000000e+00 : f32
    %296 = vector.broadcast %cst_39 : f32 to vector<1x128xf32>
    %297 = arith.divf %296, %295 : vector<1x128xf32>
    %c43 = arith.constant 43 : index
    %298 = memref.load %arg2[%c43] : memref<112xf32, #tpu.memory_space<smem>>
    %299 = vector.broadcast %298 : f32 to vector<1x128xf32>
    %300 = arith.mulf %299, %94 : vector<1x128xf32>
    %c48 = arith.constant 48 : index
    %301 = memref.load %arg2[%c48] : memref<112xf32, #tpu.memory_space<smem>>
    %302 = vector.broadcast %301 : f32 to vector<1x128xf32>
    %303 = arith.mulf %302, %123 : vector<1x128xf32>
    %c53 = arith.constant 53 : index
    %304 = memref.load %arg2[%c53] : memref<112xf32, #tpu.memory_space<smem>>
    %305 = vector.broadcast %304 : f32 to vector<1x128xf32>
    %306 = arith.mulf %305, %152 : vector<1x128xf32>
    %c58 = arith.constant 58 : index
    %307 = memref.load %arg2[%c58] : memref<112xf32, #tpu.memory_space<smem>>
    %308 = vector.broadcast %307 : f32 to vector<1x128xf32>
    %309 = arith.mulf %308, %181 : vector<1x128xf32>
    %c63 = arith.constant 63 : index
    %310 = memref.load %arg2[%c63] : memref<112xf32, #tpu.memory_space<smem>>
    %311 = vector.broadcast %310 : f32 to vector<1x128xf32>
    %312 = arith.mulf %311, %210 : vector<1x128xf32>
    %313 = arith.addf %300, %303 : vector<1x128xf32>
    %314 = arith.addf %306, %309 : vector<1x128xf32>
    %315 = arith.addf %313, %314 : vector<1x128xf32>
    %316 = arith.addf %315, %312 : vector<1x128xf32>
    %c68 = arith.constant 68 : index
    %317 = memref.load %arg2[%c68] : memref<112xf32, #tpu.memory_space<smem>>
    %318 = vector.broadcast %317 : f32 to vector<1x128xf32>
    %319 = arith.addf %316, %318 : vector<1x128xf32>
    %cst_40 = arith.constant 0.000000e+00 : f32
    %320 = vector.broadcast %cst_40 : f32 to vector<1x128xf32>
    %321 = arith.subf %320, %319 : vector<1x128xf32>
    %322 = math.exp %321 : vector<1x128xf32>
    %cst_41 = arith.constant 1.000000e+00 : f32
    %323 = vector.broadcast %cst_41 : f32 to vector<1x128xf32>
    %324 = arith.addf %323, %322 : vector<1x128xf32>
    %cst_42 = arith.constant 1.000000e+00 : f32
    %325 = vector.broadcast %cst_42 : f32 to vector<1x128xf32>
    %326 = arith.divf %325, %324 : vector<1x128xf32>
    %c44 = arith.constant 44 : index
    %327 = memref.load %arg2[%c44] : memref<112xf32, #tpu.memory_space<smem>>
    %328 = vector.broadcast %327 : f32 to vector<1x128xf32>
    %329 = arith.mulf %328, %94 : vector<1x128xf32>
    %c49 = arith.constant 49 : index
    %330 = memref.load %arg2[%c49] : memref<112xf32, #tpu.memory_space<smem>>
    %331 = vector.broadcast %330 : f32 to vector<1x128xf32>
    %332 = arith.mulf %331, %123 : vector<1x128xf32>
    %c54 = arith.constant 54 : index
    %333 = memref.load %arg2[%c54] : memref<112xf32, #tpu.memory_space<smem>>
    %334 = vector.broadcast %333 : f32 to vector<1x128xf32>
    %335 = arith.mulf %334, %152 : vector<1x128xf32>
    %c59 = arith.constant 59 : index
    %336 = memref.load %arg2[%c59] : memref<112xf32, #tpu.memory_space<smem>>
    %337 = vector.broadcast %336 : f32 to vector<1x128xf32>
    %338 = arith.mulf %337, %181 : vector<1x128xf32>
    %c64 = arith.constant 64 : index
    %339 = memref.load %arg2[%c64] : memref<112xf32, #tpu.memory_space<smem>>
    %340 = vector.broadcast %339 : f32 to vector<1x128xf32>
    %341 = arith.mulf %340, %210 : vector<1x128xf32>
    %342 = arith.addf %329, %332 : vector<1x128xf32>
    %343 = arith.addf %335, %338 : vector<1x128xf32>
    %344 = arith.addf %342, %343 : vector<1x128xf32>
    %345 = arith.addf %344, %341 : vector<1x128xf32>
    %c69 = arith.constant 69 : index
    %346 = memref.load %arg2[%c69] : memref<112xf32, #tpu.memory_space<smem>>
    %347 = vector.broadcast %346 : f32 to vector<1x128xf32>
    %348 = arith.addf %345, %347 : vector<1x128xf32>
    %cst_43 = arith.constant 0.000000e+00 : f32
    %349 = vector.broadcast %cst_43 : f32 to vector<1x128xf32>
    %350 = arith.subf %349, %348 : vector<1x128xf32>
    %351 = math.exp %350 : vector<1x128xf32>
    %cst_44 = arith.constant 1.000000e+00 : f32
    %352 = vector.broadcast %cst_44 : f32 to vector<1x128xf32>
    %353 = arith.addf %352, %351 : vector<1x128xf32>
    %cst_45 = arith.constant 1.000000e+00 : f32
    %354 = vector.broadcast %cst_45 : f32 to vector<1x128xf32>
    %355 = arith.divf %354, %353 : vector<1x128xf32>
    %c70 = arith.constant 70 : index
    %356 = memref.load %arg2[%c70] : memref<112xf32, #tpu.memory_space<smem>>
    %357 = vector.broadcast %356 : f32 to vector<1x128xf32>
    %358 = arith.mulf %357, %239 : vector<1x128xf32>
    %c75 = arith.constant 75 : index
    %359 = memref.load %arg2[%c75] : memref<112xf32, #tpu.memory_space<smem>>
    %360 = vector.broadcast %359 : f32 to vector<1x128xf32>
    %361 = arith.mulf %360, %268 : vector<1x128xf32>
    %c80 = arith.constant 80 : index
    %362 = memref.load %arg2[%c80] : memref<112xf32, #tpu.memory_space<smem>>
    %363 = vector.broadcast %362 : f32 to vector<1x128xf32>
    %364 = arith.mulf %363, %297 : vector<1x128xf32>
    %c85 = arith.constant 85 : index
    %365 = memref.load %arg2[%c85] : memref<112xf32, #tpu.memory_space<smem>>
    %366 = vector.broadcast %365 : f32 to vector<1x128xf32>
    %367 = arith.mulf %366, %326 : vector<1x128xf32>
    %c90 = arith.constant 90 : index
    %368 = memref.load %arg2[%c90] : memref<112xf32, #tpu.memory_space<smem>>
    %369 = vector.broadcast %368 : f32 to vector<1x128xf32>
    %370 = arith.mulf %369, %355 : vector<1x128xf32>
    %371 = arith.addf %358, %361 : vector<1x128xf32>
    %372 = arith.addf %364, %367 : vector<1x128xf32>
    %373 = arith.addf %371, %372 : vector<1x128xf32>
    %374 = arith.addf %373, %370 : vector<1x128xf32>
    %c95 = arith.constant 95 : index
    %375 = memref.load %arg2[%c95] : memref<112xf32, #tpu.memory_space<smem>>
    %376 = vector.broadcast %375 : f32 to vector<1x128xf32>
    %377 = arith.addf %374, %376 : vector<1x128xf32>
    %cst_46 = arith.constant 0.000000e+00 : f32
    %378 = vector.broadcast %cst_46 : f32 to vector<1x128xf32>
    %379 = arith.subf %378, %377 : vector<1x128xf32>
    %380 = math.exp %379 : vector<1x128xf32>
    %cst_47 = arith.constant 1.000000e+00 : f32
    %381 = vector.broadcast %cst_47 : f32 to vector<1x128xf32>
    %382 = arith.addf %381, %380 : vector<1x128xf32>
    %cst_48 = arith.constant 1.000000e+00 : f32
    %383 = vector.broadcast %cst_48 : f32 to vector<1x128xf32>
    %384 = arith.divf %383, %382 : vector<1x128xf32>
    %c71 = arith.constant 71 : index
    %385 = memref.load %arg2[%c71] : memref<112xf32, #tpu.memory_space<smem>>
    %386 = vector.broadcast %385 : f32 to vector<1x128xf32>
    %387 = arith.mulf %386, %239 : vector<1x128xf32>
    %c76 = arith.constant 76 : index
    %388 = memref.load %arg2[%c76] : memref<112xf32, #tpu.memory_space<smem>>
    %389 = vector.broadcast %388 : f32 to vector<1x128xf32>
    %390 = arith.mulf %389, %268 : vector<1x128xf32>
    %c81 = arith.constant 81 : index
    %391 = memref.load %arg2[%c81] : memref<112xf32, #tpu.memory_space<smem>>
    %392 = vector.broadcast %391 : f32 to vector<1x128xf32>
    %393 = arith.mulf %392, %297 : vector<1x128xf32>
    %c86 = arith.constant 86 : index
    %394 = memref.load %arg2[%c86] : memref<112xf32, #tpu.memory_space<smem>>
    %395 = vector.broadcast %394 : f32 to vector<1x128xf32>
    %396 = arith.mulf %395, %326 : vector<1x128xf32>
    %c91 = arith.constant 91 : index
    %397 = memref.load %arg2[%c91] : memref<112xf32, #tpu.memory_space<smem>>
    %398 = vector.broadcast %397 : f32 to vector<1x128xf32>
    %399 = arith.mulf %398, %355 : vector<1x128xf32>
    %400 = arith.addf %387, %390 : vector<1x128xf32>
    %401 = arith.addf %393, %396 : vector<1x128xf32>
    %402 = arith.addf %400, %401 : vector<1x128xf32>
    %403 = arith.addf %402, %399 : vector<1x128xf32>
    %c96 = arith.constant 96 : index
    %404 = memref.load %arg2[%c96] : memref<112xf32, #tpu.memory_space<smem>>
    %405 = vector.broadcast %404 : f32 to vector<1x128xf32>
    %406 = arith.addf %403, %405 : vector<1x128xf32>
    %cst_49 = arith.constant 0.000000e+00 : f32
    %407 = vector.broadcast %cst_49 : f32 to vector<1x128xf32>
    %408 = arith.subf %407, %406 : vector<1x128xf32>
    %409 = math.exp %408 : vector<1x128xf32>
    %cst_50 = arith.constant 1.000000e+00 : f32
    %410 = vector.broadcast %cst_50 : f32 to vector<1x128xf32>
    %411 = arith.addf %410, %409 : vector<1x128xf32>
    %cst_51 = arith.constant 1.000000e+00 : f32
    %412 = vector.broadcast %cst_51 : f32 to vector<1x128xf32>
    %413 = arith.divf %412, %411 : vector<1x128xf32>
    %c72 = arith.constant 72 : index
    %414 = memref.load %arg2[%c72] : memref<112xf32, #tpu.memory_space<smem>>
    %415 = vector.broadcast %414 : f32 to vector<1x128xf32>
    %416 = arith.mulf %415, %239 : vector<1x128xf32>
    %c77 = arith.constant 77 : index
    %417 = memref.load %arg2[%c77] : memref<112xf32, #tpu.memory_space<smem>>
    %418 = vector.broadcast %417 : f32 to vector<1x128xf32>
    %419 = arith.mulf %418, %268 : vector<1x128xf32>
    %c82 = arith.constant 82 : index
    %420 = memref.load %arg2[%c82] : memref<112xf32, #tpu.memory_space<smem>>
    %421 = vector.broadcast %420 : f32 to vector<1x128xf32>
    %422 = arith.mulf %421, %297 : vector<1x128xf32>
    %c87 = arith.constant 87 : index
    %423 = memref.load %arg2[%c87] : memref<112xf32, #tpu.memory_space<smem>>
    %424 = vector.broadcast %423 : f32 to vector<1x128xf32>
    %425 = arith.mulf %424, %326 : vector<1x128xf32>
    %c92 = arith.constant 92 : index
    %426 = memref.load %arg2[%c92] : memref<112xf32, #tpu.memory_space<smem>>
    %427 = vector.broadcast %426 : f32 to vector<1x128xf32>
    %428 = arith.mulf %427, %355 : vector<1x128xf32>
    %429 = arith.addf %416, %419 : vector<1x128xf32>
    %430 = arith.addf %422, %425 : vector<1x128xf32>
    %431 = arith.addf %429, %430 : vector<1x128xf32>
    %432 = arith.addf %431, %428 : vector<1x128xf32>
    %c97 = arith.constant 97 : index
    %433 = memref.load %arg2[%c97] : memref<112xf32, #tpu.memory_space<smem>>
    %434 = vector.broadcast %433 : f32 to vector<1x128xf32>
    %435 = arith.addf %432, %434 : vector<1x128xf32>
    %cst_52 = arith.constant 0.000000e+00 : f32
    %436 = vector.broadcast %cst_52 : f32 to vector<1x128xf32>
    %437 = arith.subf %436, %435 : vector<1x128xf32>
    %438 = math.exp %437 : vector<1x128xf32>
    %cst_53 = arith.constant 1.000000e+00 : f32
    %439 = vector.broadcast %cst_53 : f32 to vector<1x128xf32>
    %440 = arith.addf %439, %438 : vector<1x128xf32>
    %cst_54 = arith.constant 1.000000e+00 : f32
    %441 = vector.broadcast %cst_54 : f32 to vector<1x128xf32>
    %442 = arith.divf %441, %440 : vector<1x128xf32>
    %c73 = arith.constant 73 : index
    %443 = memref.load %arg2[%c73] : memref<112xf32, #tpu.memory_space<smem>>
    %444 = vector.broadcast %443 : f32 to vector<1x128xf32>
    %445 = arith.mulf %444, %239 : vector<1x128xf32>
    %c78 = arith.constant 78 : index
    %446 = memref.load %arg2[%c78] : memref<112xf32, #tpu.memory_space<smem>>
    %447 = vector.broadcast %446 : f32 to vector<1x128xf32>
    %448 = arith.mulf %447, %268 : vector<1x128xf32>
    %c83 = arith.constant 83 : index
    %449 = memref.load %arg2[%c83] : memref<112xf32, #tpu.memory_space<smem>>
    %450 = vector.broadcast %449 : f32 to vector<1x128xf32>
    %451 = arith.mulf %450, %297 : vector<1x128xf32>
    %c88 = arith.constant 88 : index
    %452 = memref.load %arg2[%c88] : memref<112xf32, #tpu.memory_space<smem>>
    %453 = vector.broadcast %452 : f32 to vector<1x128xf32>
    %454 = arith.mulf %453, %326 : vector<1x128xf32>
    %c93 = arith.constant 93 : index
    %455 = memref.load %arg2[%c93] : memref<112xf32, #tpu.memory_space<smem>>
    %456 = vector.broadcast %455 : f32 to vector<1x128xf32>
    %457 = arith.mulf %456, %355 : vector<1x128xf32>
    %458 = arith.addf %445, %448 : vector<1x128xf32>
    %459 = arith.addf %451, %454 : vector<1x128xf32>
    %460 = arith.addf %458, %459 : vector<1x128xf32>
    %461 = arith.addf %460, %457 : vector<1x128xf32>
    %c98 = arith.constant 98 : index
    %462 = memref.load %arg2[%c98] : memref<112xf32, #tpu.memory_space<smem>>
    %463 = vector.broadcast %462 : f32 to vector<1x128xf32>
    %464 = arith.addf %461, %463 : vector<1x128xf32>
    %cst_55 = arith.constant 0.000000e+00 : f32
    %465 = vector.broadcast %cst_55 : f32 to vector<1x128xf32>
    %466 = arith.subf %465, %464 : vector<1x128xf32>
    %467 = math.exp %466 : vector<1x128xf32>
    %cst_56 = arith.constant 1.000000e+00 : f32
    %468 = vector.broadcast %cst_56 : f32 to vector<1x128xf32>
    %469 = arith.addf %468, %467 : vector<1x128xf32>
    %cst_57 = arith.constant 1.000000e+00 : f32
    %470 = vector.broadcast %cst_57 : f32 to vector<1x128xf32>
    %471 = arith.divf %470, %469 : vector<1x128xf32>
    %c74 = arith.constant 74 : index
    %472 = memref.load %arg2[%c74] : memref<112xf32, #tpu.memory_space<smem>>
    %473 = vector.broadcast %472 : f32 to vector<1x128xf32>
    %474 = arith.mulf %473, %239 : vector<1x128xf32>
    %c79 = arith.constant 79 : index
    %475 = memref.load %arg2[%c79] : memref<112xf32, #tpu.memory_space<smem>>
    %476 = vector.broadcast %475 : f32 to vector<1x128xf32>
    %477 = arith.mulf %476, %268 : vector<1x128xf32>
    %c84 = arith.constant 84 : index
    %478 = memref.load %arg2[%c84] : memref<112xf32, #tpu.memory_space<smem>>
    %479 = vector.broadcast %478 : f32 to vector<1x128xf32>
    %480 = arith.mulf %479, %297 : vector<1x128xf32>
    %c89 = arith.constant 89 : index
    %481 = memref.load %arg2[%c89] : memref<112xf32, #tpu.memory_space<smem>>
    %482 = vector.broadcast %481 : f32 to vector<1x128xf32>
    %483 = arith.mulf %482, %326 : vector<1x128xf32>
    %c94 = arith.constant 94 : index
    %484 = memref.load %arg2[%c94] : memref<112xf32, #tpu.memory_space<smem>>
    %485 = vector.broadcast %484 : f32 to vector<1x128xf32>
    %486 = arith.mulf %485, %355 : vector<1x128xf32>
    %487 = arith.addf %474, %477 : vector<1x128xf32>
    %488 = arith.addf %480, %483 : vector<1x128xf32>
    %489 = arith.addf %487, %488 : vector<1x128xf32>
    %490 = arith.addf %489, %486 : vector<1x128xf32>
    %c99 = arith.constant 99 : index
    %491 = memref.load %arg2[%c99] : memref<112xf32, #tpu.memory_space<smem>>
    %492 = vector.broadcast %491 : f32 to vector<1x128xf32>
    %493 = arith.addf %490, %492 : vector<1x128xf32>
    %cst_58 = arith.constant 0.000000e+00 : f32
    %494 = vector.broadcast %cst_58 : f32 to vector<1x128xf32>
    %495 = arith.subf %494, %493 : vector<1x128xf32>
    %496 = math.exp %495 : vector<1x128xf32>
    %cst_59 = arith.constant 1.000000e+00 : f32
    %497 = vector.broadcast %cst_59 : f32 to vector<1x128xf32>
    %498 = arith.addf %497, %496 : vector<1x128xf32>
    %cst_60 = arith.constant 1.000000e+00 : f32
    %499 = vector.broadcast %cst_60 : f32 to vector<1x128xf32>
    %500 = arith.divf %499, %498 : vector<1x128xf32>
    %c100 = arith.constant 100 : index
    %501 = memref.load %arg2[%c100] : memref<112xf32, #tpu.memory_space<smem>>
    %502 = vector.broadcast %501 : f32 to vector<1x128xf32>
    %503 = arith.mulf %502, %384 : vector<1x128xf32>
    %c102 = arith.constant 102 : index
    %504 = memref.load %arg2[%c102] : memref<112xf32, #tpu.memory_space<smem>>
    %505 = vector.broadcast %504 : f32 to vector<1x128xf32>
    %506 = arith.mulf %505, %413 : vector<1x128xf32>
    %c104 = arith.constant 104 : index
    %507 = memref.load %arg2[%c104] : memref<112xf32, #tpu.memory_space<smem>>
    %508 = vector.broadcast %507 : f32 to vector<1x128xf32>
    %509 = arith.mulf %508, %442 : vector<1x128xf32>
    %c106 = arith.constant 106 : index
    %510 = memref.load %arg2[%c106] : memref<112xf32, #tpu.memory_space<smem>>
    %511 = vector.broadcast %510 : f32 to vector<1x128xf32>
    %512 = arith.mulf %511, %471 : vector<1x128xf32>
    %c108 = arith.constant 108 : index
    %513 = memref.load %arg2[%c108] : memref<112xf32, #tpu.memory_space<smem>>
    %514 = vector.broadcast %513 : f32 to vector<1x128xf32>
    %515 = arith.mulf %514, %500 : vector<1x128xf32>
    %516 = arith.addf %503, %506 : vector<1x128xf32>
    %517 = arith.addf %509, %512 : vector<1x128xf32>
    %518 = arith.addf %516, %517 : vector<1x128xf32>
    %519 = arith.addf %518, %515 : vector<1x128xf32>
    %c110 = arith.constant 110 : index
    %520 = memref.load %arg2[%c110] : memref<112xf32, #tpu.memory_space<smem>>
    %521 = vector.broadcast %520 : f32 to vector<1x128xf32>
    %522 = arith.addf %519, %521 : vector<1x128xf32>
    %c101 = arith.constant 101 : index
    %523 = memref.load %arg2[%c101] : memref<112xf32, #tpu.memory_space<smem>>
    %524 = vector.broadcast %523 : f32 to vector<1x128xf32>
    %525 = arith.mulf %524, %384 : vector<1x128xf32>
    %c103 = arith.constant 103 : index
    %526 = memref.load %arg2[%c103] : memref<112xf32, #tpu.memory_space<smem>>
    %527 = vector.broadcast %526 : f32 to vector<1x128xf32>
    %528 = arith.mulf %527, %413 : vector<1x128xf32>
    %c105 = arith.constant 105 : index
    %529 = memref.load %arg2[%c105] : memref<112xf32, #tpu.memory_space<smem>>
    %530 = vector.broadcast %529 : f32 to vector<1x128xf32>
    %531 = arith.mulf %530, %442 : vector<1x128xf32>
    %c107 = arith.constant 107 : index
    %532 = memref.load %arg2[%c107] : memref<112xf32, #tpu.memory_space<smem>>
    %533 = vector.broadcast %532 : f32 to vector<1x128xf32>
    %534 = arith.mulf %533, %471 : vector<1x128xf32>
    %c109 = arith.constant 109 : index
    %535 = memref.load %arg2[%c109] : memref<112xf32, #tpu.memory_space<smem>>
    %536 = vector.broadcast %535 : f32 to vector<1x128xf32>
    %537 = arith.mulf %536, %500 : vector<1x128xf32>
    %538 = arith.addf %525, %528 : vector<1x128xf32>
    %539 = arith.addf %531, %534 : vector<1x128xf32>
    %540 = arith.addf %538, %539 : vector<1x128xf32>
    %541 = arith.addf %540, %537 : vector<1x128xf32>
    %c111 = arith.constant 111 : index
    %542 = memref.load %arg2[%c111] : memref<112xf32, #tpu.memory_space<smem>>
    %543 = vector.broadcast %542 : f32 to vector<1x128xf32>
    %544 = arith.addf %541, %543 : vector<1x128xf32>
    %cst_61 = arith.constant 0.000000e+00 : f32
    %545 = vector.broadcast %cst_61 : f32 to vector<1x128xf32>
    %546 = tpu.concatenate %522, %544, %545, %545, %545, %545, %545, %545 in 0 : vector<1x128xf32>, vector<1x128xf32>, vector<1x128xf32>, vector<1x128xf32>, vector<1x128xf32>, vector<1x128xf32>, vector<1x128xf32>, vector<1x128xf32> -> vector<8x128xf32>
    %c0_62 = arith.constant 0 : index
    %c0_63 = arith.constant 0 : index
    %547 = vector.load %arg3[%c0_62, %c0_63] : memref<8x128xf32, #tpu.memory_space<vmem>>, vector<8x128xf32>
    tpu.vector_store %arg3[%c0_62, %c0_63], %546 {strides = array<i32>} : memref<8x128xf32, #tpu.memory_space<vmem>>, vector<8x128xf32>,
    return
  }
  func.func @transform_0(%arg0: i32) -> (i32, i32) {
    %c0_i32 = arith.constant 0 : i32
    %c0_i32_0 = arith.constant 0 : i32
    return %c0_i32, %arg0 : i32, i32
  }
  func.func @transform_1(%arg0: i32) -> i32 {
    %c0_i32 = arith.constant 0 : i32
    %c0_i32_0 = arith.constant 0 : i32
    return %c0_i32 : i32
  }
  func.func @transform_2(%arg0: i32) -> (i32, i32) {
    %c0_i32 = arith.constant 0 : i32
    %c0_i32_0 = arith.constant 0 : i32
    return %c0_i32, %arg0 : i32, i32
  }
}

</mosaic_0001>

<bundles_post_ra>
// kernel: tpu_custom_call.1
= control target key start
LH: loop header
LB: loop body
LE: loop exit
PB: predicated region body
PF: predicated region fallthrough
CT: control target
= control target key end

     0   :  { %s2046_s0 = inlined_call_operand.hbm [shape: f32[1,128], index: 0, kind: input, shape index: {}]   ;;  %s2047_s1 = inlined_call_operand.hbm [shape: f32[112], index: 1, kind: input, shape index: {}]   ;;  %s2048_s2 = inlined_call_operand.hbm [shape: f32[8,128], index: 2, kind: output, shape index: {}]  }
   0x1   :  { %2052 = sst [smem:[#allocation15_spill]] %s2048_s2 }
   0x2   :  { %7 = vsyncpa [#allocation3], 0 }
   0x3   :  { %8 = vsyncpa [#allocation5], 0 }
   0x4   :  { %9 = vsyncpa [#allocation4], 0  ;;  %s15_s11 = sshll.u32 %s2046_s0, 4  ;;  %s1120_s12 = smov [#allocation2]   ;;  %s16_s11 = int_to_ptr.hbm [resolvable:$true] %s15_s11 }
   0x5   :  { %s17_s13 = sshll.u32 %s1120_s12, 4  ;;  %s26_s16 = sshll.u32 %s2047_s1, 4  ;;  %s18_s13 = int_to_ptr.vmem [resolvable:$true] %s17_s13  ;;  %s27_s16 = int_to_ptr.hbm [resolvable:$true] %s26_s16 }
   0x6   :  { %20 = dma.hbm_to_vmem [thread:$0]  %s16_s11, 16, %s18_s13, [#allocation3]  }
   0x7   :  { %s1121_s17 = smov [#allocation6]  }
   0x8   :  { %29 = dma.hbm_to_smem %s27_s16, 16, %s1121_s17, [#allocation5]  }
   0x9   :  { %1114 = dma.done.wait [#allocation3], 16  }
   0xa   :  { %1115 = vsyncadd [#allocation3], 4294967280 }
   0xb   :  { %1116 = dma.done.wait [#allocation5], 16  }
   0xc   :  { %1117 = vsyncadd [#allocation5], 4294967280 }
   0xd   :  { %38 = sfence }
   0xe   :  { %s40_s18 = sld [smem:[#allocation6]]  ;;  %v39_v0 = vld [vmem:[#allocation2] sm:$0x1] }
   0xf   :  { %s860_s19 = sld [smem:[#allocation6 + $0x5]] }
  0x10   :  { %s861_s0 = sld [smem:[#allocation6 + $0x1]] }
  0x11   :  { %s862_s20 = sld [smem:[#allocation6 + $0x6]] }
  0x12   :  { %s863_s21 = sld [smem:[#allocation6 + $0x2]] }
  0x13   :  { %s864_s22 = sld [smem:[#allocation6 + $0x7]] }
  0x14   :  { %v41_v1 = vstv %s40_s18  ;;  %s865_s23 = sld [smem:[#allocation6 + $0x3]] }
  0x15   :  { %v42_v2 = vmul.f32 %v41_v1, %v39_v0  ;;  %v44_v3 = vstv %s860_s19  ;;  %s866_s1 = sld [smem:[#allocation6 + $0x8]] }
  0x16   :  { %v66_v4 = vstv %s861_s0  ;;  %s867_s24 = sld [smem:[#allocation6 + $0x4]] }
  0x17   :  { %v45_v5 = vadd.f32 %v44_v3, %v42_v2  ;;  %v67_v6 = vmul.f32 %v66_v4, %v39_v0  ;;  %v69_v7 = vstv %s862_s20  ;;  %s868_s25 = sld [smem:[#allocation6 + $0x9]] }
  0x18   :  { %v91_v8 = vstv %s863_s21  ;;  %s1144_s26 = sld [smem:[#allocation6 + $0xa]] }
  0x19   :  { %v46_v9 = vsub.f32 0.0, %v45_v5  ;;  %v70_v10 = vadd.f32 %v69_v7, %v67_v6  ;;  %v92_v11 = vmul.f32 %v91_v8, %v39_v0  ;;  %v94_v12 = vstv %s864_s22  ;;  %s1146_s27 = sld [smem:[#allocation6 + $0xf]] }
  0x1a   :  { %v116_v13 = vstv %s865_s23  ;;  %s1148_s28 = sld [smem:[#allocation6 + $0x14]] }
  0x1b   :  { %v47_v14 = vmul.f32 1.442695, %v46_v9  ;;  %v71_v15 = vsub.f32 0.0, %v70_v10  ;;  %v95_v16 = vadd.f32 %v94_v12, %v92_v11  ;;  %v117_v17 = vmul.f32 %v116_v13, %v39_v0  ;;  %s1150_s29 = sld [smem:[#allocation6 + $0x19]] }
  0x1c   :  { %v119_v18 = vstv %s866_s1  ;;  %v141_v19 = vstv %s867_s24  ;;  %s1152_s30 = sld [smem:[#allocation6 + $0x1e]] }
  0x1d   :  { %974 = vpow2.f32 %v47_v14  ;;  %v72_v20 = vmul.f32 1.442695, %v71_v15  ;;  %v96_v21 = vsub.f32 0.0, %v95_v16  ;;  %v120_v22 = vadd.f32 %v119_v18, %v117_v17  ;;  %s1154_s3 = sld [smem:[#allocation6 + $0x23]] }
  0x1e   :  { %v142_v23 = vmul.f32 %v141_v19, %v39_v0  ;;  %v144_v24 = vstv %s868_s25  ;;  %s1156_s4 = sld [smem:[#allocation6 + $0xb]]  ;;  %v166_v34 = vstv %s1144_s26 }
  0x1f   :  { %976 = vpow2.f32 %v72_v20  ;;  %v97_v25 = vmul.f32 1.442695, %v96_v21  ;;  %v121_v26 = vsub.f32 0.0, %v120_v22  ;;  %s1158_s5 = sld [smem:[#allocation6 + $0x10]]  ;;  %v169_v35 = vstv %s1146_s27 }
  0x20   :  { %v145_v27 = vadd.f32 %v144_v24, %v142_v23  ;;  %s1160_s6 = sld [smem:[#allocation6 + $0x15]]  ;;  %v172_v36 = vstv %s1148_s28 }
  0x21   :  { %978 = vpow2.f32 %v97_v25  ;;  %v122_v28 = vmul.f32 1.442695, %v121_v26  ;;  %s1162_s7 = sld [smem:[#allocation6 + $0x1a]]  ;;  %v175_v38 = vstv %s1150_s29 }
  0x22   :  { %v146_v29 = vsub.f32 0.0, %v145_v27  ;;  %s1164_s8 = sld [smem:[#allocation6 + $0x1f]]  ;;  %v178_v39 = vstv %s1152_s30 }
  0x23   :  { %v975_v30 = vpop.eup %974  ;;  %980 = vpow2.f32 %v122_v28  ;;  %s1166_s9 = sld [smem:[#allocation6 + $0x24]]  ;;  %v185_v43 = vstv %s1154_s3 }
  0x24   :  { %v1168_v31 = vadd.f32 1.0, %v975_v30  ;;  %v147_v32 = vmul.f32 1.442695, %v146_v29  ;;  %s1170_s10 = sld [smem:[#allocation6 + $0xc]]  ;;  %v207_v45 = vstv %s1156_s4 }
  0x25   :  { %v977_v33 = vpop.eup %976  ;;  %s1175_s11 = sld [smem:[#allocation6 + $0x11]]  ;;  %v210_v46 = vstv %s1158_s5 }
  0x26   :  { %982 = vrcp.f32 %v1168_v31  ;;  %v61_v37 = vand.u32 2147483648, %v1168_v31  ;;  %s1181_s12 = sld [smem:[#allocation6 + $0x16]]  ;;  %v59_v41 = vand.u32 2147483647, %v1168_v31  ;;  %v1184_v42 = vadd.f32 1.0, %v977_v33 }
  0x27   :  { %v979_v40 = vpop.eup %978  ;;  %984 = vpow2.f32 %v147_v32  ;;  %s1187_s13 = sld [smem:[#allocation6 + $0x1b]]  ;;  %vm55_vm0 = vweird.f32 %v1168_v31  ;;  %v213_v49 = vstv %s1160_s6  ;;  %v216_v50 = vstv %s1162_s7 }
  0x28   :  { %v1190_v44 = vadd.f32 1.0, %v979_v40  ;;  %s1194_s14 = sld [smem:[#allocation6 + $0x20]]  ;;  %986 = vrcp.f32 %v1184_v42  ;;  %v86_v48 = vand.u32 2147483648, %v1184_v42  ;;  %v1202_v51 = vor.u32 1.1754944e-38, %v61_v37 }
  0x29   :  { %v981_v47 = vpop.eup %980  ;;  %s1200_s15 = sld [smem:[#allocation6 + $0x25]]  ;;  %v84_v52 = vand.u32 2147483647, %v1184_v42  ;;  %vm1207_vm1 = vcmp.eq.f32.partialorder %v59_v41, 8.507059e+37  ;;  %vm80_vm2 = vweird.f32 %v1184_v42  ;;  %v219_v57 = vstv %s1164_s8 }
  0x2a   :  { %988 = vrcp.f32 %v1190_v44  ;;  %v111_v53 = vand.u32 2147483648, %v1190_v44  ;;  %v109_v55 = vand.u32 2147483647, %v1190_v44  ;;  %v1213_v56 = vadd.f32 1.0, %v981_v47  ;;  %s1216_s16 = sld [smem:[#allocation6 + $0xd]] }
  0x2b   :  { %v1218_v59 = vor.u32 1.1754944e-38, %v86_v48  ;;  %vm105_vm3 = vweird.f32 %v1190_v44  ;;  %v226_v61 = vstv %s1166_s9  ;;  %s1224_s17 = sld [smem:[#allocation6 + $0x12]]  ;;  %v248_v0 = vstv %s1170_s10 }
  0x2c   :  { %v983_v58 = vpop.eup %982  ;;  %v1221_v60 = vor.u32 1.1754944e-38, %v111_v53  ;;  %990 = vrcp.f32 %v1213_v56  ;;  %v251_v1 = vstv %s1175_s11  ;;  %s1230_s18 = sld [smem:[#allocation6 + $0x17]]  ;;  %vm1232_vm5 = vcmp.eq.f32.partialorder %v84_v52, 8.507059e+37 }
  0x2d   :  { %v985_v62 = vpop.eup %984  ;;  %v51_v63 = vmul.f32 %v983_v58, %v1168_v31  ;;  %vm56_vm4 = vweird.f32 %v983_v58  ;;  %v134_v3 = vand.u32 2147483647, %v1213_v56  ;;  %v136_v4 = vand.u32 2147483648, %v1213_v56  ;;  %s1240_s19 = sld [smem:[#allocation6 + $0x1c]] }
  0x2e   :  { %v1238_v5 = vadd.f32 1.0, %v985_v62  ;;  %v987_v6 = vpop.eup %986  ;;  %vm1242_vm6 = vcmp.eq.f32.partialorder %v109_v55, 8.507059e+37  ;;  %vm130_vm7 = vweird.f32 %v1213_v56  ;;  %v254_v9 = vstv %s1181_s12  ;;  %s1256_s0 = sld [smem:[#allocation6 + $0x21]]  ;;  %vm1261_vm9 = vmor %vm55_vm0, %vm56_vm4 }
  0x2f   :  { %v52_v7 = vsub.f32 1.0, %v51_v63  ;;  %v257_v10 = vstv %s1187_s13  ;;  %v76_v12 = vmul.f32 %v987_v6, %v1184_v42  ;;  %vm81_vm8 = vweird.f32 %v987_v6  ;;  %s1273_s20 = sld [smem:[#allocation6 + $0x26]] }
  0x30   :  { %v989_v11 = vpop.eup %988  ;;  %v260_v13 = vstv %s1194_s14  ;;  %v267_v14 = vstv %s1200_s15  ;;  %v1253_v17 = vor.u32 1.1754944e-38, %v136_v4  ;;  %992 = vrcp.f32 %v1238_v5  ;;  %s1277_s21 = sld [smem:[#allocation6 + $0xe]]  ;;  %vm1284_vm14 = vmor %vm80_vm2, %vm81_vm8 }
  0x31   :  { %v53_v15 = vmul.f32 %v983_v58, %v52_v7  ;;  %v101_v16 = vmul.f32 %v989_v11, %v1190_v44  ;;  %v77_v19 = vsub.f32 1.0, %v76_v12  ;;  %vm106_vm10 = vweird.f32 %v989_v11  ;;  %s1291_s22 = sld [smem:[#allocation6 + $0x13]] }
  0x32   :  { %vm1265_vm11 = vcmp.eq.f32.partialorder %v134_v3, 8.507059e+37  ;;  %v159_v21 = vand.u32 2147483647, %v1238_v5  ;;  %v161_v22 = vand.u32 2147483648, %v1238_v5  ;;  %v991_v23 = vpop.eup %990  ;;  %vm155_vm12 = vweird.f32 %v1238_v5  ;;  %vm1301_vm15 = vmor %vm105_vm3, %vm106_vm10  ;;  %s1310_s23 = sld [smem:[#allocation6 + $0x18]] }
  0x33   :  { %v54_v24 = vadd.f32 %v983_v58, %v53_v15  ;;  %v102_v25 = vsub.f32 1.0, %v101_v16  ;;  %v289_v26 = vstv %s1216_s16  ;;  %v78_v27 = vmul.f32 %v987_v6, %v77_v19  ;;  %s1319_s1 = sld [smem:[#allocation6 + $0x1d]] }
  0x34   :  { %v126_v28 = vmul.f32 %v991_v23, %v1213_v56  ;;  %vm131_vm13 = vweird.f32 %v991_v23  ;;  %v292_v29 = vstv %s1224_s17  ;;  %v1288_v33 = vor.u32 1.1754944e-38, %v161_v22  ;;  %s1324_s24 = sld [smem:[#allocation6 + $0x22]] }
  0x35   :  { %v58_v30 = vsel %vm1261_vm9, %v983_v58, %v54_v24  ;;  %v103_v32 = vmul.f32 %v989_v11, %v102_v25  ;;  %v295_v37 = vstv %s1230_s18  ;;  %v79_v41 = vadd.f32 %v987_v6, %v78_v27  ;;  %vm1334_vm2 = vmor %vm130_vm7, %vm131_vm13  ;;  %s1340_s25 = sld [smem:[#allocation6 + $0x27]] }
  0x36   :  { %v1296_v40 = vsel %vm1207_vm1, %v1202_v51, %v58_v30  ;;  %v127_v47 = vsub.f32 1.0, %v126_v28  ;;  %vm1305_vm0 = vcmp.eq.f32.partialorder %v159_v21, 8.507059e+37  ;;  %v298_v52 = vstv %s1240_s19  ;;  %v993_v53 = vpop.eup %992  ;;  %s1349_s26 = sld [smem:[#allocation6 + $0x28]] }
  0x37   :  { %v104_v51 = vadd.f32 %v989_v11, %v103_v32  ;;  %v167_v54 = vmul.f32 %v166_v34, %v1296_v40  ;;  %v208_v44 = vmul.f32 %v207_v45, %v1296_v40  ;;  %v249_v55 = vmul.f32 %v248_v0, %v1296_v40  ;;  %s1361_s4 = sld [smem:[#allocation6 + $0x2d]] }
  0x38   :  { %v83_v58 = vsel %vm1284_vm14, %v987_v6, %v79_v41  ;;  %v128_v62 = vmul.f32 %v991_v23, %v127_v47  ;;  %v151_v63 = vmul.f32 %v993_v53, %v1238_v5  ;;  %vm156_vm1 = vweird.f32 %v993_v53  ;;  %s1368_s27 = sld [smem:[#allocation6 + $0x32]] }
  0x39   :  { %v88_v34 = vsel %vm1232_vm5, %v1218_v59, %v83_v58  ;;  %v108_v45 = vsel %vm1301_vm15, %v989_v11, %v104_v51  ;;  %v290_v3 = vmul.f32 %v289_v26, %v1296_v40  ;;  %v301_v4 = vstv %s1256_s0  ;;  %vm1376_vm3 = vmor %vm155_vm12, %vm156_vm1  ;;  %s1380_s28 = sld [smem:[#allocation6 + $0x37]] }
  0x3a   :  { %v1345_v59 = vsel %vm1242_vm6, %v1221_v60, %v108_v45  ;;  %v129_v2 = vadd.f32 %v991_v23, %v128_v62  ;;  %v152_v6 = vsub.f32 1.0, %v151_v63  ;;  %v170_v7 = vmul.f32 %v169_v35, %v88_v34  ;;  %s1388_s5 = sld [smem:[#allocation6 + $0x3c]] }
  0x3b   :  { %v173_v56 = vmul.f32 %v172_v36, %v1345_v59  ;;  %v211_v11 = vmul.f32 %v210_v46, %v88_v34  ;;  %v214_v12 = vmul.f32 %v213_v49, %v1345_v59  ;;  %v252_v8 = vmul.f32 %v251_v1, %v88_v34  ;;  %s1392_s6 = sld [smem:[#allocation6 + $0x41]] }
  0x3c   :  { %v133_v35 = vsel %vm1334_vm2, %v991_v23, %v129_v2  ;;  %v153_v60 = vmul.f32 %v993_v53, %v152_v6  ;;  %v180_v15 = vadd.f32 %v170_v7, %v167_v54  ;;  %v255_v36 = vmul.f32 %v254_v9, %v1345_v59  ;;  %s1396_s29 = sld [smem:[#allocation6 + $0x29]] }
  0x3d   :  { %v138_v46 = vsel %vm1265_vm11, %v1253_v17, %v133_v35  ;;  %v221_v1 = vadd.f32 %v211_v11, %v208_v44  ;;  %v262_v16 = vadd.f32 %v252_v8, %v249_v55  ;;  %v293_v18 = vmul.f32 %v292_v29, %v88_v34  ;;  %s1403_s7 = sld [smem:[#allocation6 + $0x2e]] }
  0x3e   :  { %v154_v9 = vadd.f32 %v993_v53, %v153_v60  ;;  %v176_v19 = vmul.f32 %v175_v38, %v138_v46  ;;  %v217_v21 = vmul.f32 %v216_v50, %v138_v46  ;;  %v258_v17 = vmul.f32 %v257_v10, %v138_v46  ;;  %s1409_s10 = sld [smem:[#allocation6 + $0x33]] }
  0x3f   :  { %v296_v5 = vmul.f32 %v295_v37, %v1345_v59  ;;  %v299_v20 = vmul.f32 %v298_v52, %v138_v46  ;;  %v303_v22 = vadd.f32 %v293_v18, %v290_v3  ;;  %v308_v23 = vstv %s1273_s20  ;;  %s1413_s11 = sld [smem:[#allocation6 + $0x38]] }
  0x40   :  { %v158_v38 = vsel %vm1376_vm3, %v993_v53, %v154_v9  ;;  %v181_v24 = vadd.f32 %v176_v19, %v173_v56  ;;  %v222_v50 = vadd.f32 %v217_v21, %v214_v12  ;;  %v263_v25 = vadd.f32 %v258_v17, %v255_v36  ;;  %s1416_s30 = sld [smem:[#allocation6 + $0x3d]] }
  0x41   :  { %v163_v10 = vsel %vm1305_vm0, %v1288_v33, %v158_v38  ;;  %v304_v26 = vadd.f32 %v299_v20, %v296_v5  ;;  %v330_v27 = vstv %s1277_s21  ;;  %v333_v28 = vstv %s1291_s22  ;;  %s1420_s8 = sld [smem:[#allocation6 + $0x42]] }
  0x42   :  { %v179_v29 = vmul.f32 %v178_v39, %v163_v10  ;;  %v182_v30 = vadd.f32 %v181_v24, %v180_v15  ;;  %v220_v31 = vmul.f32 %v219_v57, %v163_v10  ;;  %v223_v32 = vadd.f32 %v222_v50, %v221_v1  ;;  %s1427_s12 = sld [smem:[#allocation6 + $0x2a]] }
  0x43   :  { %v261_v37 = vmul.f32 %v260_v13, %v163_v10  ;;  %v264_v33 = vadd.f32 %v263_v25, %v262_v16  ;;  %v302_v41 = vmul.f32 %v301_v4, %v163_v10  ;;  %v305_v42 = vadd.f32 %v304_v26, %v303_v22  ;;  %s1432_s13 = sld [smem:[#allocation6 + $0x2f]] }
  0x44   :  { %v183_v47 = vadd.f32 %v182_v30, %v179_v29  ;;  %v224_v39 = vadd.f32 %v223_v32, %v220_v31  ;;  %v331_v48 = vmul.f32 %v330_v27, %v1296_v40  ;;  %v334_v57 = vmul.f32 %v333_v28, %v88_v34  ;;  %s1434_s3 = sld [smem:[#allocation6 + $0x34]] }
  0x45   :  { %v265_v52 = vadd.f32 %v264_v33, %v261_v37  ;;  %v306_v53 = vadd.f32 %v305_v42, %v302_v41  ;;  %v336_v51 = vstv %s1310_s23  ;;  %v339_v54 = vstv %s1319_s1  ;;  %s1436_s9 = sld [smem:[#allocation6 + $0x39]] }
  0x46   :  { %v186_v13 = vadd.f32 %v185_v43, %v183_v47  ;;  %v227_v44 = vadd.f32 %v226_v61, %v224_v39  ;;  %v337_v55 = vmul.f32 %v336_v51, %v1345_v59  ;;  %v340_v58 = vmul.f32 %v339_v54, %v138_v46  ;;  %s1438_s14 = sld [smem:[#allocation6 + $0x3e]] }
  0x47   :  { %v268_v40 = vadd.f32 %v267_v14, %v265_v52  ;;  %v309_v62 = vadd.f32 %v308_v23, %v306_v53  ;;  %v342_v63 = vstv %s1324_s24  ;;  %v344_v34 = vadd.f32 %v334_v57, %v331_v48  ;;  %s1441_s15 = sld [smem:[#allocation6 + $0x2b]] }
  0x48   :  { %v187_v45 = vsub.f32 0.0, %v186_v13  ;;  %v228_v0 = vsub.f32 0.0, %v227_v44  ;;  %v343_v3 = vmul.f32 %v342_v63, %v163_v10  ;;  %v345_v4 = vadd.f32 %v340_v58, %v337_v55  ;;  %s1443_s16 = sld [smem:[#allocation6 + $0x30]] }
  0x49   :  { %v269_v43 = vsub.f32 0.0, %v268_v40  ;;  %v310_v61 = vsub.f32 0.0, %v309_v62  ;;  %v349_v56 = vstv %s1340_s25  ;;  %s1445_s17 = sld [smem:[#allocation6 + $0x35]]  ;;  %v371_v35 = vstv %s1349_s26 }
  0x4a   :  { %v188_v59 = vmul.f32 1.442695, %v187_v45  ;;  %v229_v2 = vmul.f32 1.442695, %v228_v0  ;;  %v346_v6 = vadd.f32 %v345_v4, %v344_v34  ;;  %s1447_s18 = sld [smem:[#allocation6 + $0x3a]]  ;;  %v374_v60 = vstv %s1361_s4 }
  0x4b   :  { %v270_v14 = vmul.f32 1.442695, %v269_v43  ;;  %v311_v7 = vmul.f32 1.442695, %v310_v61  ;;  %s1449_s19 = sld [smem:[#allocation6 + $0x43]]  ;;  %v377_v15 = vstv %s1368_s27  ;;  %v380_v36 = vstv %s1380_s28 }
  0x4c   :  { %994 = vpow2.f32 %v188_v59  ;;  %v347_v11 = vadd.f32 %v346_v6, %v343_v3  ;;  %s1454_s0 = sld [smem:[#allocation6 + $0x3f]]  ;;  %v383_v46 = vstv %s1388_s5  ;;  %v412_v49 = vstv %s1396_s29 }
  0x4d   :  { %996 = vpow2.f32 %v229_v2  ;;  %v415_v1 = vstv %s1403_s7  ;;  %s1460_s20 = sld [smem:[#allocation6 + $0x2c]]  ;;  %v418_v9 = vstv %s1409_s10  ;;  %v421_v19 = vstv %s1413_s11 }
  0x4e   :  { %998 = vpow2.f32 %v270_v14  ;;  %v350_v12 = vadd.f32 %v349_v56, %v347_v11  ;;  %v424_v21 = vstv %s1416_s30  ;;  %v453_v20 = vstv %s1427_s12  ;;  %s1474_s21 = sld [smem:[#allocation6 + $0x31]] }
  0x4f   :  { %1000 = vpow2.f32 %v311_v7  ;;  %v456_v22 = vstv %s1432_s13  ;;  %v459_v23 = vstv %s1434_s3  ;;  %v462_v50 = vstv %s1436_s9  ;;  %s1484_s22 = sld [smem:[#allocation6 + $0x36]] }
  0x50   :  { %v351_v8 = vsub.f32 0.0, %v350_v12  ;;  %v465_v25 = vstv %s1438_s14  ;;  %v390_v26 = vstv %s1392_s6  ;;  %v494_v27 = vstv %s1441_s15  ;;  %s1500_s23 = sld [smem:[#allocation6 + $0x3b]] }
  0x51   :  { %v497_v28 = vstv %s1443_s16  ;;  %v500_v30 = vstv %s1445_s17  ;;  %v503_v31 = vstv %s1447_s18  ;;  %v431_v47 = vstv %s1420_s8  ;;  %s1509_s1 = sld [smem:[#allocation6 + $0x40]] }
  0x52   :  { %v995_v16 = vpop.eup %994  ;;  %v352_v18 = vmul.f32 1.442695, %v351_v8  ;;  %v472_v39 = vstv %s1449_s19  ;;  %v506_v48 = vstv %s1454_s0  ;;  %s1545_s24 = sld [smem:[#allocation6 + $0x44]] }
  0x53   :  { %v997_v17 = vpop.eup %996  ;;  %v1465_v5 = vadd.f32 1.0, %v995_v16  ;;  %v535_v57 = vstv %s1460_s20  ;;  %s1556_s25 = sld [smem:[#allocation6 + $0x45]] }
  0x54   :  { %v999_v38 = vpop.eup %998  ;;  %v1470_v24 = vadd.f32 1.0, %v997_v17  ;;  %1002 = vpow2.f32 %v352_v18  ;;  %v538_v0 = vstv %s1474_s21  ;;  %s1562_s2 = sld [smem:[#allocation6 + $0x46]] }
  0x55   :  { %v1001_v10 = vpop.eup %1000  ;;  %1004 = vrcp.f32 %v1465_v5  ;;  %v200_v29 = vand.u32 2147483647, %v1465_v5  ;;  %v202_v32 = vand.u32 2147483648, %v1465_v5  ;;  %v1488_v33 = vadd.f32 1.0, %v999_v38  ;;  %s1609_s26 = sld [smem:[#allocation6 + $0x5f]] }
  0x56   :  { %1006 = vrcp.f32 %v1470_v24  ;;  %v241_v37 = vand.u32 2147483647, %v1470_v24  ;;  %v1490_v41 = vadd.f32 1.0, %v1001_v10  ;;  %v243_v42 = vand.u32 2147483648, %v1470_v24  ;;  %s1622_s4 = sld [smem:[#allocation6 + $0x47]] }
  0x57   :  { %vm196_vm4 = vweird.f32 %v1465_v5  ;;  %vm237_vm5 = vweird.f32 %v1470_v24  ;;  %1008 = vrcp.f32 %v1488_v33  ;;  %vm1502_vm6 = vcmp.eq.f32.partialorder %v200_v29, 8.507059e+37  ;;  %s1630_s29 = sld [smem:[#allocation6 + $0x4c]] }
  0x58   :  { %v282_v51 = vand.u32 2147483647, %v1488_v33  ;;  %v284_v54 = vand.u32 2147483648, %v1488_v33  ;;  %1010 = vrcp.f32 %v1490_v41  ;;  %v203_v44 = vor.u32 1.1754944e-38, %v202_v32  ;;  %s1640_s7 = sld [smem:[#allocation6 + $0x51]] }
  0x59   :  { %vm1511_vm7 = vcmp.eq.f32.partialorder %v241_v37, 8.507059e+37  ;;  %v323_v58 = vand.u32 2147483647, %v1490_v41  ;;  %v244_v34 = vor.u32 1.1754944e-38, %v243_v42  ;;  %v325_v45 = vand.u32 2147483648, %v1490_v41  ;;  %2085 = sst [smem:[#allocation11_spill]] %s1556_s25 }
  0x5a   :  { %v1003_v52 = vpop.eup %1002  ;;  %vm278_vm8 = vweird.f32 %v1488_v33  ;;  %vm319_vm9 = vweird.f32 %v1490_v41  ;;  %vm1525_vm11 = vcmp.eq.f32.partialorder %v282_v51, 8.507059e+37  ;;  %v285_v61 = vor.u32 1.1754944e-38, %v284_v54  ;;  %2088 = sst [smem:[#allocation12_spill]] %s1562_s2 }
  0x5b   :  { %v1005_v13 = vpop.eup %1004  ;;  %v1516_v40 = vadd.f32 1.0, %v1003_v52  ;;  %v541_v59 = vstv %s1484_s22  ;;  %vm1530_vm13 = vcmp.eq.f32.partialorder %v323_v58, 8.507059e+37  ;;  %v326_v8 = vor.u32 1.1754944e-38, %v325_v45  ;;  %s1567_s25 = sld [smem:[#allocation6 + $0x4b]] }
  0x5c   :  { %v1007_v62 = vpop.eup %1006  ;;  %v192_v63 = vmul.f32 %v1005_v13, %v1465_v5  ;;  %vm197_vm10 = vweird.f32 %v1005_v13  ;;  %v544_v10 = vstv %s1500_s23  ;;  %v547_v37 = vstv %s1509_s1  ;;  %s1580_s2 = sld [smem:[#allocation6 + $0x50]] }
  0x5d   :  { %v233_v3 = vmul.f32 %v1007_v62, %v1470_v24  ;;  %1012 = vrcp.f32 %v1516_v40  ;;  %v1009_v2 = vpop.eup %1008  ;;  %vm238_vm12 = vweird.f32 %v1007_v62  ;;  %v364_v7 = vand.u32 2147483647, %v1516_v40  ;;  %vm1539_vm14 = vmor %vm196_vm4, %vm197_vm10  ;;  %s1648_s27 = sld [smem:[#allocation6 + $0x56]] }
  0x5e   :  { %v193_v4 = vsub.f32 1.0, %v192_v63  ;;  %v1011_v56 = vpop.eup %1010  ;;  %v274_v12 = vmul.f32 %v1009_v2, %v1488_v33  ;;  %v366_v16 = vand.u32 2147483648, %v1516_v40  ;;  %vm360_vm15 = vweird.f32 %v1516_v40  ;;  %vm1551_vm0 = vmor %vm237_vm5, %vm238_vm12  ;;  %s1652_s28 = sld [smem:[#allocation6 + $0x5b]] }
  0x5f   :  { %v234_v6 = vsub.f32 1.0, %v233_v3  ;;  %v315_v38 = vmul.f32 %v1011_v56, %v1490_v41  ;;  %vm279_vm1 = vweird.f32 %v1009_v2  ;;  %vm320_vm2 = vweird.f32 %v1011_v56  ;;  %s1662_s10 = sld [smem:[#allocation6 + $0x60]] }
  0x60   :  { %v194_v11 = vmul.f32 %v1005_v13, %v193_v4  ;;  %v275_v5 = vsub.f32 1.0, %v274_v12  ;;  %vm1558_vm3 = vcmp.eq.f32.partialorder %v364_v7, 8.507059e+37  ;;  %v367_v45 = vor.u32 1.1754944e-38, %v366_v16  ;;  %vm1576_vm4 = vmor %vm278_vm8, %vm279_vm1  ;;  %s1666_s11 = sld [smem:[#allocation6 + $0x48]] }
  0x61   :  { %v235_v17 = vmul.f32 %v1007_v62, %v234_v6  ;;  %v316_v51 = vsub.f32 1.0, %v315_v38  ;;  %2089 = sst [smem:[#allocation13_spill]] %s1567_s25 }
  0x62   :  { %v195_v29 = vadd.f32 %v1005_v13, %v194_v11  ;;  %v276_v58 = vmul.f32 %v1009_v2, %v275_v5  ;;  %2092 = sst [smem:[#allocation14_spill]] %s1580_s2 }
  0x63   :  { %v1013_v42 = vpop.eup %1012  ;;  %v236_v52 = vadd.f32 %v1007_v62, %v235_v17  ;;  %v317_v6 = vmul.f32 %v1011_v56, %v316_v51  ;;  %s1593_s25 = sld [smem:[#allocation6 + $0x55]] }
  0x64   :  { %v199_v24 = vsel %vm1539_vm14, %v1005_v13, %v195_v29  ;;  %v356_v63 = vmul.f32 %v1013_v42, %v1516_v40  ;;  %vm361_vm5 = vweird.f32 %v1013_v42  ;;  %s1601_s2 = sld [smem:[#allocation6 + $0x5a]] }
  0x65   :  { %v204_v3 = vsel %vm1502_vm6, %v203_v44, %v199_v24  ;;  %v240_v4 = vsel %vm1551_vm0, %v1007_v62, %v236_v52  ;;  %v277_v44 = vadd.f32 %v1009_v2, %v276_v58  ;;  %vm1587_vm6 = vmor %vm319_vm9, %vm320_vm2  ;;  %v318_v11 = vadd.f32 %v1011_v56, %v317_v6  ;;  %s1674_s5 = sld [smem:[#allocation6 + $0x4d]] }
  0x66   :  { %v245_v53 = vsel %vm1511_vm7, %v244_v34, %v240_v4  ;;  %v357_v33 = vsub.f32 1.0, %v356_v63  ;;  %v372_v7 = vmul.f32 %v371_v35, %v204_v3  ;;  %v413_v16 = vmul.f32 %v412_v49, %v204_v3  ;;  %vm1618_vm7 = vmor %vm360_vm15, %vm361_vm5  ;;  %s1676_s30 = sld [smem:[#allocation6 + $0x52]] }
  0x67   :  { %v375_v12 = vmul.f32 %v374_v60, %v245_v53  ;;  %v416_v55 = vmul.f32 %v415_v1, %v245_v53  ;;  %v281_v41 = vsel %vm1576_vm4, %v1009_v2, %v277_v44  ;;  %v454_v35 = vmul.f32 %v453_v20, %v204_v3  ;;  %s1682_s12 = sld [smem:[#allocation6 + $0x57]] }
  0x68   :  { %v358_v34 = vmul.f32 %v1013_v42, %v357_v33  ;;  %v457_v18 = vmul.f32 %v456_v22, %v245_v53  ;;  %v286_v60 = vsel %vm1525_vm11, %v285_v61, %v281_v41  ;;  %v322_v49 = vsel %vm1587_vm6, %v1011_v56, %v318_v11  ;;  %s2097_s13 = sld [smem:[#allocation11_spill]] }
  0x69   :  { %v385_v20 = vadd.f32 %v375_v12, %v372_v7  ;;  %v426_v22 = vadd.f32 %v416_v55, %v413_v16  ;;  %v327_v43 = vsel %vm1530_vm13, %v326_v8, %v322_v49  ;;  %v378_v2 = vmul.f32 %v377_v15, %v286_v60  ;;  %s1690_s3 = sld [smem:[#allocation6 + $0x5c]] }
  0x6a   :  { %v359_v61 = vadd.f32 %v1013_v42, %v358_v34  ;;  %v419_v56 = vmul.f32 %v418_v9, %v286_v60  ;;  %v381_v40 = vmul.f32 %v380_v36, %v327_v43  ;;  %v422_v17 = vmul.f32 %v421_v19, %v327_v43  ;;  %s1695_s9 = sld [smem:[#allocation6 + $0x61]] }
  0x6b   :  { %v460_v38 = vmul.f32 %v459_v23, %v286_v60  ;;  %v463_v14 = vmul.f32 %v462_v50, %v327_v43  ;;  %v467_v9 = vadd.f32 %v457_v18, %v454_v35  ;;  %v495_v8 = vmul.f32 %v494_v27, %v204_v3  ;;  %s1697_s6 = sld [smem:[#allocation6 + $0x49]] }
  0x6c   :  { %v363_v15 = vsel %vm1618_vm7, %v1013_v42, %v359_v61  ;;  %v498_v36 = vmul.f32 %v497_v28, %v245_v53  ;;  %v386_v23 = vadd.f32 %v381_v40, %v378_v2  ;;  %v427_v50 = vadd.f32 %v422_v17, %v419_v56  ;;  %s1700_s8 = sld [smem:[#allocation6 + $0x4e]] }
  0x6d   :  { %v368_v19 = vsel %vm1558_vm3, %v367_v45, %v363_v15  ;;  %v468_v29 = vadd.f32 %v463_v14, %v460_v38  ;;  %v501_v28 = vmul.f32 %v500_v30, %v286_v60  ;;  %v504_v54 = vmul.f32 %v503_v31, %v327_v43  ;;  %s2098_s14 = sld [smem:[#allocation12_spill]] }
  0x6e   :  { %v384_v32 = vmul.f32 %v383_v46, %v368_v19  ;;  %v425_v27 = vmul.f32 %v424_v21, %v368_v19  ;;  %v466_v5 = vmul.f32 %v465_v25, %v368_v19  ;;  %v387_v42 = vadd.f32 %v386_v23, %v385_v20  ;;  %s2099_s15 = sld [smem:[#allocation13_spill]] }
  0x6f   :  { %v428_v52 = vadd.f32 %v427_v50, %v426_v22  ;;  %v469_v51 = vadd.f32 %v468_v29, %v467_v9  ;;  %v507_v46 = vmul.f32 %v506_v48, %v368_v19  ;;  %v508_v21 = vadd.f32 %v498_v36, %v495_v8  ;;  %s2100_s16 = sld [smem:[#allocation14_spill]] }
  0x70   :  { %v536_v25 = vmul.f32 %v535_v57, %v204_v3  ;;  %v539_v30 = vmul.f32 %v538_v0, %v245_v53  ;;  %v388_v24 = vadd.f32 %v387_v42, %v384_v32  ;;  %v509_v31 = vadd.f32 %v504_v54, %v501_v28  ;;  %s1702_s17 = sld [smem:[#allocation6 + $0x53]] }
  0x71   :  { %v429_v58 = vadd.f32 %v428_v52, %v425_v27  ;;  %v470_v63 = vadd.f32 %v469_v51, %v466_v5  ;;  %v542_v45 = vmul.f32 %v541_v59, %v286_v60  ;;  %v545_v48 = vmul.f32 %v544_v10, %v327_v43  ;;  %s1704_s18 = sld [smem:[#allocation6 + $0x58]] }
  0x72   :  { %v549_v4 = vadd.f32 %v539_v30, %v536_v25  ;;  %v391_v57 = vadd.f32 %v390_v26, %v388_v24  ;;  %v510_v13 = vadd.f32 %v509_v31, %v508_v21  ;;  %v513_v6 = vstv %s1545_s24  ;;  %s1706_s19 = sld [smem:[#allocation6 + $0x5d]] }
  0x73   :  { %v432_v0 = vadd.f32 %v431_v47, %v429_v58  ;;  %v473_v3 = vadd.f32 %v472_v39, %v470_v63  ;;  %v548_v53 = vmul.f32 %v547_v37, %v368_v19  ;;  %v550_v44 = vadd.f32 %v545_v48, %v542_v45  ;;  %s1708_s0 = sld [smem:[#allocation6 + $0x4a]] }
  0x74   :  { %v392_v59 = vsub.f32 0.0, %v391_v57  ;;  %v511_v33 = vadd.f32 %v510_v13, %v507_v46  ;;  %v554_v7 = vstv %s2097_s13  ;;  %v576_v35 = vstv %s2098_s14  ;;  %s1711_s20 = sld [smem:[#allocation6 + $0x4f]] }
  0x75   :  { %v433_v10 = vsub.f32 0.0, %v432_v0  ;;  %v474_v62 = vsub.f32 0.0, %v473_v3  ;;  %v551_v26 = vadd.f32 %v550_v44, %v549_v4  ;;  %v579_v18 = vstv %s2099_s15  ;;  %s1716_s21 = sld [smem:[#allocation6 + $0x54]] }
  0x76   :  { %v393_v47 = vmul.f32 1.442695, %v392_v59  ;;  %v514_v12 = vadd.f32 %v513_v6, %v511_v33  ;;  %v582_v60 = vstv %s2100_s16  ;;  %v585_v49 = vstv %s1593_s25  ;;  %s1721_s22 = sld [smem:[#allocation6 + $0x59]] }
  0x77   :  { %v434_v39 = vmul.f32 1.442695, %v433_v10  ;;  %v475_v11 = vmul.f32 1.442695, %v474_v62  ;;  %v552_v37 = vadd.f32 %v551_v26, %v548_v53  ;;  %v588_v20 = vstv %s1601_s2  ;;  %s1736_s23 = sld [smem:[#allocation6 + $0x5e]] }
  0x78   :  { %1014 = vpow2.f32 %v393_v47  ;;  %v515_v16 = vsub.f32 0.0, %v514_v12  ;;  %v617_v22 = vstv %s1622_s4  ;;  %v620_v43 = vstv %s1630_s29  ;;  %s1878_s1 = sld [smem:[#allocation6 + $0x62]] }
  0x79   :  { %1016 = vpow2.f32 %v434_v39  ;;  %v555_v55 = vadd.f32 %v554_v7, %v552_v37  ;;  %v623_v2 = vstv %s1640_s7  ;;  %v626_v56 = vstv %s1648_s27  ;;  %s1890_s24 = sld [smem:[#allocation6 + $0x63]] }
  0x7a   :  { %1018 = vpow2.f32 %v475_v11  ;;  %v516_v41 = vmul.f32 1.442695, %v515_v16  ;;  %v629_v40 = vstv %s1652_s28  ;;  %v658_v17 = vstv %s1666_s11  ;;  %s1914_s2 = sld [smem:[#allocation6 + $0x64]] }
  0x7b   :  { %v556_v34 = vsub.f32 0.0, %v555_v55  ;;  %v661_v15 = vstv %s1674_s5  ;;  %v664_v9 = vstv %s1676_s30  ;;  %v595_v19 = vstv %s1609_s26  ;;  %s1916_s25 = sld [smem:[#allocation6 + $0x66]] }
  0x7c   :  { %1020 = vpow2.f32 %v516_v41  ;;  %v667_v23 = vstv %s1682_s12  ;;  %v670_v50 = vstv %s1690_s3  ;;  %v636_v29 = vstv %s1662_s10  ;;  %s1918_s26 = sld [smem:[#allocation6 + $0x68]]  ;;  %s1122_s12 = smov [#allocation7]  }
  0x7d   :  { %v557_v1 = vmul.f32 1.442695, %v556_v34  ;;  %v699_v32 = vstv %s1697_s6  ;;  %v702_v27 = vstv %s1700_s8  ;;  %v705_v42 = vstv %s1702_s17  ;;  %s1920_s4 = sld [smem:[#allocation6 + $0x65]]  ;;  %s847_s13 = sshll.u32 %s1122_s12, 4  ;;  %s848_s13 = int_to_ptr.vmem [resolvable:$true] %s847_s13 }
  0x7e   :  { %v1015_v61 = vpop.eup %1014  ;;  %v708_v52 = vstv %s1704_s18  ;;  %v677_v30 = vstv %s1695_s9  ;;  %v711_v24 = vstv %s1706_s19  ;;  %v740_v58 = vstv %s1708_s0  ;;  %s1922_s29 = sld [smem:[#allocation6 + $0x67]] }
  0x7f   :  { %v1017_v38 = vpop.eup %1016  ;;  %v1727_v14 = vadd.f32 1.0, %v1015_v61  ;;  %1022 = vpow2.f32 %v557_v1  ;;  %v743_v31 = vstv %s1711_s20  ;;  %v746_v45 = vstv %s1716_s21  ;;  %s1924_s7 = sld [smem:[#allocation6 + $0x69]] }
  0x80   :  { %v1019_v8 = vpop.eup %1018  ;;  %v1731_v36 = vadd.f32 1.0, %v1017_v38  ;;  %v749_v48 = vstv %s1721_s22  ;;  %v752_v62 = vstv %s1736_s23  ;;  %s1926_s27 = sld [smem:[#allocation6 + $0x6a]] }
  0x81   :  { %1024 = vrcp.f32 %v1727_v14  ;;  %v405_v28 = vand.u32 2147483647, %v1727_v14  ;;  %v407_v51 = vand.u32 2147483648, %v1727_v14  ;;  %v1748_v46 = vadd.f32 1.0, %v1019_v8  ;;  %s1928_s28 = sld [smem:[#allocation6 + $0x6c]] }
  0x82   :  { %v1021_v5 = vpop.eup %1020  ;;  %1026 = vrcp.f32 %v1731_v36  ;;  %v446_v54 = vand.u32 2147483647, %v1731_v36  ;;  %v448_v25 = vand.u32 2147483648, %v1731_v36  ;;  %vm401_vm8 = vweird.f32 %v1727_v14  ;;  %s1961_s10 = sld [smem:[#allocation6 + $0x6b]] }
  0x83   :  { %v1750_v21 = vadd.f32 1.0, %v1021_v5  ;;  %1028 = vrcp.f32 %v1748_v46  ;;  %vm1761_vm9 = vcmp.eq.f32.partialorder %v405_v28, 8.507059e+37  ;;  %vm442_vm10 = vweird.f32 %v1731_v36  ;;  %s1968_s11 = sld [smem:[#allocation6 + $0x6d]] }
  0x84   :  { %v408_v0 = vor.u32 1.1754944e-38, %v407_v51  ;;  %vm1767_vm11 = vcmp.eq.f32.partialorder %v446_v54, 8.507059e+37  ;;  %v487_v13 = vand.u32 2147483647, %v1748_v46  ;;  %v449_v59 = vor.u32 1.1754944e-38, %v448_v25  ;;  %s2015_s5 = sld [smem:[#allocation6 + $0x6e]] }
  0x85   :  { %v1023_v63 = vpop.eup %1022  ;;  %1030 = vrcp.f32 %v1750_v21  ;;  %v489_v10 = vand.u32 2147483648, %v1748_v46  ;;  %v528_v26 = vand.u32 2147483647, %v1750_v21  ;;  %v530_v7 = vand.u32 2147483648, %v1750_v21  ;;  %s970_s30 = sld [smem:[#allocation6 + $0x6f]] }
  0x86   :  { %v1772_v6 = vadd.f32 1.0, %v1023_v63  ;;  %vm483_vm13 = vweird.f32 %v1748_v46  ;;  %vm524_vm14 = vweird.f32 %v1750_v21  ;;  %vm1783_vm0 = vcmp.eq.f32.partialorder %v487_v13, 8.507059e+37  ;;  %s2137_s6 = sld [smem:[#allocation15_spill]] }
  0x87   :  { %v1025_v57 = vpop.eup %1024  ;;  %v490_v34 = vor.u32 1.1754944e-38, %v489_v10  ;;  %vm1797_vm2 = vcmp.eq.f32.partialorder %v528_v26, 8.507059e+37  ;;  %v531_v28 = vor.u32 1.1754944e-38, %v530_v7 }
  0x88   :  { %v1027_v53 = vpop.eup %1026  ;;  %v397_v44 = vmul.f32 %v1025_v57, %v1727_v14  ;;  %1032 = vrcp.f32 %v1772_v6  ;;  %vm402_vm12 = vweird.f32 %v1025_v57  ;;  %v569_v37 = vand.u32 2147483647, %v1772_v6 }
  0x89   :  { %v438_v33 = vmul.f32 %v1027_v53, %v1731_v36  ;;  %v1029_v39 = vpop.eup %1028  ;;  %vm443_vm15 = vweird.f32 %v1027_v53  ;;  %v571_v1 = vand.u32 2147483648, %v1772_v6  ;;  %vm1792_vm1 = vmor %vm401_vm8, %vm402_vm12  ;;  %vm565_vm5 = vweird.f32 %v1772_v6 }
  0x8a   :  { %v398_v47 = vsub.f32 1.0, %v397_v44  ;;  %v479_v41 = vmul.f32 %v1029_v39, %v1748_v46  ;;  %vm1803_vm3 = vmor %vm442_vm10, %vm443_vm15  ;;  %vm484_vm4 = vweird.f32 %v1029_v39  ;;  %vm1808_vm7 = vcmp.eq.f32.partialorder %v569_v37, 8.507059e+37 }
  0x8b   :  { %v439_v11 = vsub.f32 1.0, %v438_v33  ;;  %v1031_v16 = vpop.eup %1030  ;;  %v572_v26 = vor.u32 1.1754944e-38, %v571_v1  ;;  %vm1821_vm8 = vmor %vm483_vm13, %vm484_vm4 }
  0x8c   :  { %v399_v55 = vmul.f32 %v1025_v57, %v398_v47  ;;  %v520_v8 = vmul.f32 %v1031_v16, %v1750_v21  ;;  %v480_v14 = vsub.f32 1.0, %v479_v41  ;;  %vm525_vm6 = vweird.f32 %v1031_v16  ;;  %s849_s8 = sshll.u32 %s2137_s6, 4  ;;  %s850_s8 = int_to_ptr.hbm [resolvable:$true] %s849_s8 }
  0x8d   :  { %v440_v38 = vmul.f32 %v1027_v53, %v439_v11 }
  0x8e   :  { %v400_v51 = vadd.f32 %v1025_v57, %v399_v55  ;;  %v1033_v25 = vpop.eup %1032  ;;  %v521_v13 = vsub.f32 1.0, %v520_v8  ;;  %v481_v10 = vmul.f32 %v1029_v39, %v480_v14 }
  0x8f   :  { %v441_v63 = vadd.f32 %v1027_v53, %v440_v38  ;;  %v561_v33 = vmul.f32 %v1033_v25, %v1772_v6  ;;  %vm566_vm10 = vweird.f32 %v1033_v25 }
  0x90   :  { %v404_v36 = vsel %vm1792_vm1, %v1025_v57, %v400_v51  ;;  %v522_v57 = vmul.f32 %v1031_v16, %v521_v13  ;;  %v482_v55 = vadd.f32 %v1029_v39, %v481_v10 }
  0x91   :  { %v409_v7 = vsel %vm1761_vm9, %v408_v0, %v404_v36  ;;  %v445_v47 = vsel %vm1803_vm3, %v1027_v53, %v441_v63  ;;  %vm1829_vm9 = vmor %vm524_vm14, %vm525_vm6  ;;  %v562_v0 = vsub.f32 1.0, %v561_v33 }
  0x92   :  { %v450_v37 = vsel %vm1767_vm11, %v449_v59, %v445_v47  ;;  %v577_v46 = vmul.f32 %v576_v35, %v409_v7  ;;  %v523_v53 = vadd.f32 %v1031_v16, %v522_v57  ;;  %v618_v1 = vmul.f32 %v617_v22, %v409_v7  ;;  %vm1854_vm11 = vmor %vm565_vm5, %vm566_vm10 }
  0x93   :  { %v580_v41 = vmul.f32 %v579_v18, %v450_v37  ;;  %v621_v3 = vmul.f32 %v620_v43, %v450_v37  ;;  %v486_v21 = vsel %vm1821_vm8, %v1029_v39, %v482_v55  ;;  %v563_v59 = vmul.f32 %v1033_v25, %v562_v0 }
  0x94   :  { %v659_v61 = vmul.f32 %v658_v17, %v409_v7  ;;  %v662_v35 = vmul.f32 %v661_v15, %v450_v37  ;;  %v491_v18 = vsel %vm1783_vm0, %v490_v34, %v486_v21  ;;  %v527_v22 = vsel %vm1829_vm9, %v1031_v16, %v523_v53 }
  0x95   :  { %v590_v39 = vadd.f32 %v580_v41, %v577_v46  ;;  %v631_v38 = vadd.f32 %v621_v3, %v618_v1  ;;  %v532_v17 = vsel %vm1797_vm2, %v531_v28, %v527_v22  ;;  %v564_v15 = vadd.f32 %v1033_v25, %v563_v59 }
  0x96   :  { %v583_v12 = vmul.f32 %v582_v60, %v491_v18  ;;  %v624_v34 = vmul.f32 %v623_v2, %v491_v18  ;;  %v586_v16 = vmul.f32 %v585_v49, %v532_v17  ;;  %v627_v6 = vmul.f32 %v626_v56, %v532_v17 }
  0x97   :  { %v665_v8 = vmul.f32 %v664_v9, %v491_v18  ;;  %v668_v51 = vmul.f32 %v667_v23, %v532_v17  ;;  %v568_v5 = vsel %vm1854_vm11, %v1033_v25, %v564_v15  ;;  %v672_v28 = vadd.f32 %v662_v35, %v659_v61 }
  0x98   :  { %v700_v60 = vmul.f32 %v699_v32, %v409_v7  ;;  %v703_v2 = vmul.f32 %v702_v27, %v450_v37  ;;  %v573_v49 = vsel %vm1808_vm7, %v572_v26, %v568_v5  ;;  %v591_v56 = vadd.f32 %v586_v16, %v583_v12 }
  0x99   :  { %v632_v9 = vadd.f32 %v627_v6, %v624_v34  ;;  %v673_v23 = vadd.f32 %v668_v51, %v665_v8  ;;  %v589_v54 = vmul.f32 %v588_v20, %v573_v49  ;;  %v630_v14 = vmul.f32 %v629_v40, %v573_v49 }
  0x9a   :  { %v671_v32 = vmul.f32 %v670_v50, %v573_v49  ;;  %v706_v27 = vmul.f32 %v705_v42, %v491_v18  ;;  %v592_v25 = vadd.f32 %v591_v56, %v590_v39  ;;  %v709_v44 = vmul.f32 %v708_v52, %v532_v17 }
  0x9b   :  { %v633_v63 = vadd.f32 %v632_v9, %v631_v38  ;;  %v674_v13 = vadd.f32 %v673_v23, %v672_v28  ;;  %v712_v20 = vmul.f32 %v711_v24, %v573_v49  ;;  %v713_v40 = vadd.f32 %v703_v2, %v700_v60 }
  0x9c   :  { %v741_v50 = vmul.f32 %v740_v58, %v409_v7  ;;  %v744_v36 = vmul.f32 %v743_v31, %v450_v37  ;;  %v593_v42 = vadd.f32 %v592_v25, %v589_v54  ;;  %v714_v26 = vadd.f32 %v709_v44, %v706_v27 }
  0x9d   :  { %v634_v10 = vadd.f32 %v633_v63, %v630_v14  ;;  %v675_v33 = vadd.f32 %v674_v13, %v671_v32  ;;  %v747_v47 = vmul.f32 %v746_v45, %v491_v18  ;;  %v750_v11 = vmul.f32 %v749_v48, %v532_v17 }
  0x9e   :  { %v754_v57 = vadd.f32 %v744_v36, %v741_v50  ;;  %v596_v52 = vadd.f32 %v595_v19, %v593_v42  ;;  %v715_v4 = vadd.f32 %v714_v26, %v713_v40  ;;  %v718_v58 = vstv %s1878_s1 }
  0x9f   :  { %v637_v24 = vadd.f32 %v636_v29, %v634_v10  ;;  %v678_v55 = vadd.f32 %v677_v30, %v675_v33  ;;  %v753_v31 = vmul.f32 %v752_v62, %v573_v49  ;;  %v755_v7 = vadd.f32 %v750_v11, %v747_v47 }
  0xa0   :  { %v597_v37 = vsub.f32 0.0, %v596_v52  ;;  %v716_v53 = vadd.f32 %v715_v4, %v712_v20  ;;  %v759_v45 = vstv %s1890_s24  ;;  %v803_v34 = vstv %s1920_s4 }
  0xa1   :  { %v638_v0 = vsub.f32 0.0, %v637_v24  ;;  %v679_v46 = vsub.f32 0.0, %v678_v55  ;;  %v756_v41 = vadd.f32 %v755_v7, %v754_v57  ;;  %v781_v6 = vstv %s1914_s2 }
  0xa2   :  { %v598_v1 = vmul.f32 1.442695, %v597_v37  ;;  %v719_v21 = vadd.f32 %v718_v58, %v716_v53  ;;  %v806_v8 = vstv %s1922_s29  ;;  %v809_v51 = vstv %s1924_s7 }
  0xa3   :  { %v639_v48 = vmul.f32 1.442695, %v638_v0  ;;  %v680_v3 = vmul.f32 1.442695, %v679_v46  ;;  %v757_v19 = vadd.f32 %v756_v41, %v753_v31  ;;  %v784_v28 = vstv %s1916_s25 }
  0xa4   :  { %1034 = vpow2.f32 %v598_v1  ;;  %v720_v29 = vsub.f32 0.0, %v719_v21  ;;  %v787_v60 = vstv %s1918_s26  ;;  %v790_v2 = vstv %s1926_s27 }
  0xa5   :  { %1036 = vpow2.f32 %v639_v48  ;;  %v760_v30 = vadd.f32 %v759_v45, %v757_v19  ;;  %v793_v9 = vstv %s1928_s28 }
  0xa6   :  { %1038 = vpow2.f32 %v680_v3  ;;  %v721_v62 = vmul.f32 1.442695, %v720_v29 }
  0xa7   :  { %v761_v59 = vsub.f32 0.0, %v760_v30 }
  0xa8   :  { %1040 = vpow2.f32 %v721_v62 }
  0xa9   :  { %v762_v61 = vmul.f32 1.442695, %v761_v59 }
  0xaa   :  { %v1035_v35 = vpop.eup %1034 }
  0xab   :  { %v1037_v18 = vpop.eup %1036  ;;  %v600_v22 = vadd.f32 1.0, %v1035_v35  ;;  %1042 = vpow2.f32 %v762_v61 }
  0xac   :  { %v1039_v43 = vpop.eup %1038  ;;  %v641_v39 = vadd.f32 1.0, %v1037_v18 }
  0xad   :  { %1044 = vrcp.f32 %v600_v22  ;;  %v610_v17 = vand.u32 2147483647, %v600_v22  ;;  %v1930_v15 = vadd.f32 1.0, %v1039_v43  ;;  %v612_v16 = vand.u32 2147483648, %v600_v22 }
  0xae   :  { %v1041_v38 = vpop.eup %1040  ;;  %1046 = vrcp.f32 %v641_v39  ;;  %v651_v49 = vand.u32 2147483647, %v641_v39  ;;  %v653_v56 = vand.u32 2147483648, %v641_v39  ;;  %vm606_vm12 = vweird.f32 %v600_v22 }
  0xaf   :  { %v1932_v12 = vadd.f32 1.0, %v1041_v38  ;;  %1048 = vrcp.f32 %v1930_v15  ;;  %vm1944_vm13 = vcmp.eq.f32.partialorder %v610_v17, 8.507059e+37  ;;  %vm647_vm14 = vweird.f32 %v641_v39 }
  0xb0   :  { %v613_v25 = vor.u32 1.1754944e-38, %v612_v16  ;;  %v692_v63 = vand.u32 2147483647, %v1930_v15  ;;  %v694_v13 = vand.u32 2147483648, %v1930_v15  ;;  %vm1955_vm0 = vcmp.eq.f32.partialorder %v651_v49, 8.507059e+37 }
  0xb1   :  { %v1043_v5 = vpop.eup %1042  ;;  %1050 = vrcp.f32 %v1932_v12  ;;  %v733_v20 = vand.u32 2147483647, %v1932_v12  ;;  %v735_v40 = vand.u32 2147483648, %v1932_v12  ;;  %v654_v42 = vor.u32 1.1754944e-38, %v653_v56 }
  0xb2   :  { %v1948_v14 = vadd.f32 1.0, %v1043_v5  ;;  %vm688_vm2 = vweird.f32 %v1930_v15  ;;  %vm729_vm3 = vweird.f32 %v1932_v12  ;;  %vm1964_vm4 = vcmp.eq.f32.partialorder %v692_v63, 8.507059e+37 }
  0xb3   :  { %v1045_v23 = vpop.eup %1044  ;;  %v695_v52 = vor.u32 1.1754944e-38, %v694_v13  ;;  %vm1977_vm6 = vcmp.eq.f32.partialorder %v733_v20, 8.507059e+37  ;;  %v736_v31 = vor.u32 1.1754944e-38, %v735_v40  ;;  %v812_v16 = vstv %s1961_s10 }
  0xb4   :  { %v1047_v32 = vpop.eup %1046  ;;  %v602_v27 = vmul.f32 %v1045_v23, %v600_v22  ;;  %1052 = vrcp.f32 %v1948_v14  ;;  %vm607_vm15 = vweird.f32 %v1045_v23  ;;  %vm770_vm10 = vweird.f32 %v1948_v14 }
  0xb5   :  { %v643_v44 = vmul.f32 %v1047_v32, %v641_v39  ;;  %v1049_v10 = vpop.eup %1048  ;;  %vm648_vm1 = vweird.f32 %v1047_v32  ;;  %vm1972_vm5 = vmor %vm606_vm12, %vm607_vm15  ;;  %v774_v45 = vand.u32 2147483647, %v1948_v14  ;;  %v776_v21 = vand.u32 2147483648, %v1948_v14 }
  0xb6   :  { %v603_v50 = vsub.f32 1.0, %v602_v27  ;;  %v684_v11 = vmul.f32 %v1049_v10, %v1930_v15  ;;  %vm1983_vm7 = vmor %vm647_vm14, %vm648_vm1  ;;  %vm689_vm8 = vweird.f32 %v1049_v10  ;;  %v815_v5 = vstv %s1968_s11 }
  0xb7   :  { %v644_v33 = vsub.f32 1.0, %v643_v44  ;;  %v1051_v26 = vpop.eup %1050  ;;  %vm1999_vm11 = vmor %vm688_vm2, %vm689_vm8  ;;  %vm775_vm15 = vcmp.eq.f32.partialorder %v774_v45, 8.507059e+37  ;;  %vm829_vm1 = vcmask 1041408   ;;  %vm831_vm2 = vcmask 1042432  }
  0xb8   :  { %v604_v47 = vmul.f32 %v1045_v23, %v603_v50  ;;  %v725_v4 = vmul.f32 %v1051_v26, %v1932_v12  ;;  %v685_v0 = vsub.f32 1.0, %v684_v11  ;;  %vm730_vm9 = vweird.f32 %v1051_v26 }
  0xb9   :  { %v645_v55 = vmul.f32 %v1047_v32, %v644_v33 }
  0xba   :  { %v605_v7 = vadd.f32 %v1045_v23, %v604_v47  ;;  %v1053_v46 = vpop.eup %1052  ;;  %v726_v41 = vsub.f32 1.0, %v725_v4  ;;  %v686_v48 = vmul.f32 %v1049_v10, %v685_v0 }
  0xbb   :  { %v646_v53 = vadd.f32 %v1047_v32, %v645_v55  ;;  %v766_v3 = vmul.f32 %v1053_v46, %v1948_v14  ;;  %vm771_vm12 = vweird.f32 %v1053_v46 }
  0xbc   :  { %v609_v1 = vsel %vm1972_vm5, %v1045_v23, %v605_v7  ;;  %v727_v62 = vmul.f32 %v1051_v26, %v726_v41  ;;  %v687_v61 = vadd.f32 %v1049_v10, %v686_v48  ;;  %vm772_vm14 = vmor %vm770_vm10, %vm771_vm12  ;;  %vm837_vm5 = vcmask 1045504  }
  0xbd   :  { %v614_v19 = vsel %vm1944_vm13, %v613_v25, %v609_v1  ;;  %v650_v29 = vsel %vm1983_vm7, %v1047_v32, %v646_v53  ;;  %vm2007_vm13 = vmor %vm729_vm3, %vm730_vm9  ;;  %v767_v18 = vsub.f32 1.0, %v766_v3  ;;  %vm833_vm3 = vcmask 1043456  }
  0xbe   :  { %v655_v59 = vsel %vm1955_vm0, %v654_v42, %v650_v29  ;;  %v782_v22 = vmul.f32 %v781_v6, %v614_v19  ;;  %v728_v43 = vadd.f32 %v1051_v26, %v727_v62  ;;  %v804_v38 = vmul.f32 %v803_v34, %v614_v19 }
  0xbf   :  { %v785_v39 = vmul.f32 %v784_v28, %v655_v59  ;;  %v807_v17 = vmul.f32 %v806_v8, %v655_v59  ;;  %v691_v15 = vsel %vm1999_vm11, %v1049_v10, %v687_v61  ;;  %v768_v12 = vmul.f32 %v1053_v46, %v767_v18 }
  0xc0   :  { %v696_v6 = vsel %vm1964_vm4, %v695_v52, %v691_v15  ;;  %v732_v28 = vsel %vm2007_vm13, %v1051_v26, %v728_v43  ;;  %v777_v34 = vor.u32 1.1754944e-38, %v776_v21  ;;  %v800_v42 = vstv %s2015_s5 }
  0xc1   :  { %v737_v8 = vsel %vm1977_vm6, %v736_v31, %v732_v28  ;;  %v769_v49 = vadd.f32 %v1053_v46, %v768_v12  ;;  %v788_v56 = vmul.f32 %v787_v60, %v696_v6  ;;  %v810_v23 = vmul.f32 %v809_v51, %v696_v6 }
  0xc2   :  { %v791_v54 = vmul.f32 %v790_v2, %v737_v8  ;;  %v795_v32 = vadd.f32 %v785_v39, %v782_v22  ;;  %v813_v27 = vmul.f32 %v812_v16, %v737_v8  ;;  %v817_v25 = vadd.f32 %v807_v17, %v804_v38 }
  0xc3   :  { %v773_v63 = vsel %vm772_vm14, %v1053_v46, %v769_v49  ;;  %v822_v10 = vstv %s970_s30  ;;  %vm827_vm0 = vcmask 1040384   ;;  %vm835_vm4 = vcmask 1044480  }
  0xc4   :  { %v778_v14 = vsel %vm775_vm15, %v777_v34, %v773_v63  ;;  %v796_v13 = vadd.f32 %v791_v54, %v788_v56  ;;  %v818_v44 = vadd.f32 %v813_v27, %v810_v23  ;;  %vm839_vm6 = vcmask 1046528  }
  0xc5   :  { %v794_v20 = vmul.f32 %v793_v9, %v778_v14  ;;  %v816_v40 = vmul.f32 %v815_v5, %v778_v14 }
  0xc6   :  { %v797_v50 = vadd.f32 %v796_v13, %v795_v32  ;;  %v819_v36 = vadd.f32 %v818_v44, %v817_v25 }
  0xc8   :  { %v798_v33 = vadd.f32 %v797_v50, %v794_v20  ;;  %v820_v60 = vadd.f32 %v819_v36, %v816_v40 }
  0xca   :  { %v801_v26 = vadd.f32 %v800_v42, %v798_v33  ;;  %v823_v51 = vadd.f32 %v822_v10, %v820_v60 }
  0xcc   :  { %v825_v2 = vperm.slane %v823_v51, 0 }
  0xce   :  { %v828_v47 = vsel %vm827_vm0, %v801_v26, %v825_v2 }
  0xcf   :  { %v830_v11 = vsel %vm829_vm1, %v828_v47, 0.0 }
  0xd0   :  { %v832_v57 = vsel %vm831_vm2, %v830_v11, 0.0 }
  0xd1   :  { %v834_v9 = vsel %vm833_vm3, %v832_v57, 0.0 }
  0xd2   :  { %v836_v52 = vsel %vm835_vm4, %v834_v9, 0.0 }
  0xd3   :  { %v838_v24 = vsel %vm837_vm5, %v836_v52, 0.0 }
  0xd4   :  { %v840_v55 = vsel %vm839_vm6, %v838_v24, 0.0 }
  0xd5   :  { %841 = vst [vmem:[#allocation7] sm:$0xff] %v840_v55 }
  0xd6   :  { %852 = dma.vmem_to_hbm [thread:$0]  %s848_s13, 128, %s850_s8, [#allocation4]  }
  0xd7   :  { %1118 = dma.done.wait [#allocation4], 128  }
  0xd8   :  { %1119 = vsyncadd [#allocation4], 4294967168 }
  0xd9   :  { %857 = vsyncpa [#allocation3], 1 }
  0xda   :  { %858 = vsyncpa [#allocation4], 1 }
  0xdb   :  { %859 = vsyncpa [#allocation5], 1 }

</bundles_post_ra>
